<compile_context>
chip_gen: v7x
topology: tpu7x:2x2x1
jax: 0.10.0
libtpu: 0.0.40
codegen_flags: <defaults>
</compile_context>

<pallas_src>
import functools

import jax
import jax.numpy as jnp
from jax import lax
from jax.experimental import pallas as pl
from jax.experimental.pallas import tpu as pltpu

EPS = 1e-5


def resnet_block_kernel(x_ref, w1_ref, w2_ref, gamma_ref, beta_ref, mask_ref,
                        alpha_ref, scale_ref, out_ref, abuf_ref,
                        *, c, wp, off, pw, n_valid):
    """ResnetBlock forward; channels on sublanes, padded flat spatial on lanes.

    x_ref        : (C, PW) f32   x on the zero-padded grid, flat (n, hp, wp)
    w1_ref/w2_ref: (9, C, C) bf16 conv weights, tap-major (t = dh*3 + dw)
    gamma/beta   : (C, 1) f32    BatchNorm affine params (shared by both BNs)
    mask_ref     : (1, PW) f32   1.0 at interior positions, 0.0 at halo/tail
    alpha/scale  : (1,) f32      SMEM scalars (PReLU slope, residual scale)
    out_ref      : (C, PW) f32   output on the padded grid
    abuf_ref     : (C, OFF+PW+OFF) bf16 scratch (zero margins + staged taps)
    """
    mask = mask_ref[...]                           # (1, PW), lane-dense
    alpha = alpha_ref[0]
    inv_cnt = jnp.float32(1.0 / n_valid)

    def bn_prelu(y):
        # train-mode BatchNorm2d: fused single-pass sum / sum-of-squares stats
        # over the interior mask; f32 throughout; variance clamped >= 0.
        ym = y * mask
        s = jnp.sum(ym, axis=1, keepdims=True)            # (C, 1)
        ss = jnp.sum(ym * y, axis=1, keepdims=True)        # (C, 1)
        mean = s * inv_cnt
        var = jnp.maximum(ss * inv_cnt - mean * mean, 0.0)
        yn = gamma_ref[...] * (y - mean) * lax.rsqrt(var + EPS) + beta_ref[...]
        return jnp.where(yn > 0, yn, alpha * yn)           # shared-slope PReLU

    # Zero only the two 128-lane-aligned margins, once (keeps the tap reads
    # that run off the padded grid finite; those outputs are masked anyway).
    abuf_ref[:, :off] = jnp.zeros((c, off), jnp.bfloat16)
    abuf_ref[:, off + pw:] = jnp.zeros((c, off), jnp.bfloat16)

    def conv3x3(w_ref):
        # 3x3 conv on the padded grid: 9 tap-shifted (C,C)x(C,PW) bf16 MXU
        # matmuls with f32 accumulation, reading shifted slices of the staging
        # buffer directly (no im2col scratch, no conv bias -- cancelled by BN).
        acc = None
        for t in range(9):
            dh, dw = t // 3, t % 3
            shift = (dh - 1) * wp + (dw - 1)
            tap = abuf_ref[:, off + shift: off + shift + pw]       # (C, PW) bf16
            d = jnp.dot(w_ref[t], tap, preferred_element_type=jnp.float32)
            acc = d if acc is None else acc + d
        return acc

    # ---- conv1 + BN + PReLU (taps built in-kernel from staged x) ----
    abuf_ref[:, off:off + pw] = x_ref[...].astype(jnp.bfloat16)    # lane-aligned
    a1 = bn_prelu(conv3x3(w1_ref)) * mask   # re-zero halo/tail -> conv2 padding

    # ---- conv2 + BN + PReLU (re-stage a1; margins are still zero) ----
    abuf_ref[:, off:off + pw] = a1.astype(jnp.bfloat16)
    a2 = bn_prelu(conv3x3(w2_ref))

    # residual = x itself, re-read from VMEM at the very end (f32, exact)
    out_ref[...] = a2 * scale_ref[0] + x_ref[...]


def resnet_block(x_nchw, w1, b1, w2, b2, gamma, beta, alpha, scale=1.0):
    # Conv biases are mathematically no-ops under train-mode BatchNorm (mean
    # subtraction cancels a per-channel constant), so they are not sent to the
    # kernel (removes two DMAs + two full C-by-PW adds).
    del b1, b2

    x = x_nchw.astype(jnp.float32)
    N, C, H, W = x.shape
    Hp, Wp = H + 2, W + 2
    P = N * Hp * Wp                               # padded-grid positions
    PW = ((P + 127) // 128) * 128                 # lane-dense width (mult of 128)
    OFF = ((Wp + 1 + 127) // 128) * 128           # margin >= Wp+1, lane-aligned
    LBUF = OFF + PW + OFF

    # x on the zero-padded grid, flattened (n, hp, wp) onto lanes: (C, PW).
    # This is the ONLY activation-sized input (no wrapper-side im2col).
    x_pad = jnp.pad(x, ((0, 0), (0, 0), (1, 1), (1, 1)))           # (N, C, Hp, Wp)
    x_flat = jnp.transpose(x_pad, (1, 0, 2, 3)).reshape(C, P)
    x_flat = jnp.pad(x_flat, ((0, 0), (0, PW - P)))

    # conv weights OIHW -> (9, C_out, C_in), tap-major; bf16 MXU operands.
    w1t = jnp.transpose(w1, (2, 3, 0, 1)).reshape(9, C, C).astype(jnp.bfloat16)
    w2t = jnp.transpose(w2, (2, 3, 0, 1)).reshape(9, C, C).astype(jnp.bfloat16)

    # interior mask on the padded grid (1 at real output pixels, 0 at halo/tail)
    hm = (jnp.arange(Hp) >= 1) & (jnp.arange(Hp) <= H)
    wm = (jnp.arange(Wp) >= 1) & (jnp.arange(Wp) <= W)
    m2d = (hm[:, None] & wm[None, :]).astype(jnp.float32)           # (Hp, Wp)
    mask = jnp.tile(m2d.reshape(1, Hp * Wp), (N, 1)).reshape(1, P)
    mask = jnp.pad(mask, ((0, 0), (0, PW - P)))

    kern = functools.partial(resnet_block_kernel, c=C, wp=Wp, off=OFF, pw=PW,
                             n_valid=N * H * W)

    vmem = pl.BlockSpec(memory_space=pltpu.MemorySpace.VMEM)
    smem = pl.BlockSpec(memory_space=pltpu.MemorySpace.SMEM)

    # True VMEM footprint (inputs + output + scratch) with headroom, capped at
    # 64 MiB (v7x physical VMEM); no more 8x over-request.
    vmem_bytes = (C * PW * 4                    # x (f32)
                  + 2 * 9 * C * C * 2           # weights (bf16)
                  + 2 * C * 4                   # gamma, beta
                  + PW * 4                      # mask
                  + C * PW * 4                  # out (f32)
                  + C * LBUF * 2)               # abuf scratch (bf16)
    vmem_limit = int(min(max(2 * vmem_bytes, 8 * 1024 * 1024), 64 * 1024 * 1024))

    # Cost estimate: flops from the 18 per-tap matmuls + elementwise; HBM bytes
    # count only real inputs/outputs (not on-chip scratch).
    flops = 2 * (9 * 2 * C * C * PW) + 30 * C * PW
    hbm_bytes = (C * PW * 4 + 2 * 9 * C * C * 2 + 2 * C * 4 + PW * 4 + 8
                 + C * PW * 4)
    cost = pl.CostEstimate(flops=flops, transcendentals=2 * C,
                           bytes_accessed=hbm_bytes)

    out_flat = pl.pallas_call(
        kern,
        out_shape=jax.ShapeDtypeStruct((C, PW), jnp.float32),
        in_specs=[vmem] * 6 + [smem, smem],
        out_specs=vmem,
        scratch_shapes=[pltpu.VMEM((C, LBUF), jnp.bfloat16)],
        compiler_params=pltpu.CompilerParams(vmem_limit_bytes=vmem_limit),
        cost_estimate=cost,
    )(x_flat, w1t, w2t,
      gamma.reshape(C, 1).astype(jnp.float32),
      beta.reshape(C, 1).astype(jnp.float32),
      mask,
      jnp.asarray([alpha], jnp.float32), jnp.asarray([scale], jnp.float32))

    # padded-grid (C, PW) -> NCHW interior (pure XLA layout work)
    out = out_flat[:, :P].reshape(C, N, Hp, Wp)[:, :, 1:H + 1, 1:W + 1]
    return jnp.transpose(out, (1, 0, 2, 3))


def reference(x, w1, b1, w2, b2, gamma, beta, alpha, scale=1.0):
    """Pure-JAX f32 reference of the module (with conv biases), sanity check."""
    def conv(y, w, b):
        out = lax.conv_general_dilated(
            y, w, window_strides=(1, 1), padding=((1, 1), (1, 1)),
            dimension_numbers=("NCHW", "OIHW", "NCHW"))
        return out + b.reshape(1, -1, 1, 1)

    def bn(y):
        m = jnp.mean(y, axis=(0, 2, 3), keepdims=True)
        v = jnp.mean((y - m) ** 2, axis=(0, 2, 3), keepdims=True)
        return (gamma.reshape(1, -1, 1, 1) * (y - m) / jnp.sqrt(v + EPS)
                + beta.reshape(1, -1, 1, 1))

    def prelu(y):
        return jnp.where(y > 0, y, alpha * y)

    out = prelu(bn(conv(x, w1, b1)))
    out = prelu(bn(conv(out, w2, b2)))
    return out * scale + x


if __name__ == "__main__":
    key = jax.random.PRNGKey(0)
    N, C, H, W = 2, 4, 16, 16
    K = 3

    k = jax.random.split(key, 6)
    x = jax.random.normal(k[0], (N, C, H, W), jnp.float32)
    # Conv2d(C, C, 3) weights (OIHW) + biases, deterministic init.
    w1 = jax.random.normal(k[1], (C, C, K, K), jnp.float32) * 0.2
    b1 = jax.random.normal(k[2], (C,), jnp.float32) * 0.1
    w2 = jax.random.normal(k[3], (C, C, K, K), jnp.float32) * 0.2
    b2 = jax.random.normal(k[4], (C,), jnp.float32) * 0.1
    # BatchNorm2d affine params (PyTorch default init: weight=1, bias=0).
    gamma = jnp.ones((C,), jnp.float32)
    beta = jnp.zeros((C,), jnp.float32)
    # PReLU(init=0.5) shared slope.
    alpha = 0.5
    scale = 1.0

    out = resnet_block(x, w1, b1, w2, b2, gamma, beta, alpha, scale)
    out = jax.block_until_ready(out)

    ref = jax.block_until_ready(reference(x, w1, b1, w2, b2, gamma, beta, alpha, scale))
    assert out.shape == (N, C, H, W)
    # Tolerance reflects bf16 MXU operands (f32 accumulation) vs. the f32
    # reference; the kernel additionally drops the (BN-cancelled) conv biases.
    assert jnp.allclose(out, ref, atol=5e-2, rtol=5e-2), "mismatch vs JAX reference"

    print("KERNEL_OK")
</pallas_src>

<mosaic_0001>
module attributes {stable_mosaic.version = 11 : i64} {
  func.func @resnet_block_kernel(%arg0: memref<4x768xf32, #tpu.memory_space<vmem>>, %arg1: memref<9x4x4xbf16, #tpu.memory_space<vmem>>, %arg2: memref<9x4x4xbf16, #tpu.memory_space<vmem>>, %arg3: memref<4x1xf32, #tpu.memory_space<vmem>>, %arg4: memref<4x1xf32, #tpu.memory_space<vmem>>, %arg5: memref<1x768xf32, #tpu.memory_space<vmem>>, %arg6: memref<1xf32, #tpu.memory_space<smem>>, %arg7: memref<1xf32, #tpu.memory_space<smem>>, %arg8: memref<4x768xf32, #tpu.memory_space<vmem>>, %arg9: memref<4x1024xbf16, #tpu.memory_space<vmem>>) attributes {dimension_semantics = [], scalar_prefetch = 0 : i64, scratch_operands = 1 : i64, tpu.core_type = #tpu.core_type<tc>} {
    %c0 = arith.constant 0 : index
    %c0_0 = arith.constant 0 : index
    %0 = vector.load %arg5[%c0, %c0_0] : memref<1x768xf32, #tpu.memory_space<vmem>>, vector<1x768xf32>
    %c0_1 = arith.constant 0 : index
    %1 = memref.load %arg6[%c0_1] : memref<1xf32, #tpu.memory_space<smem>>
    %cst = arith.constant 0.000000e+00 : bf16
    %2 = vector.broadcast %cst : bf16 to vector<4x128xbf16>
    %c0_2 = arith.constant 0 : index
    %c0_3 = arith.constant 0 : index
    %3 = vector.load %arg9[%c0_2, %c0_3] : memref<4x1024xbf16, #tpu.memory_space<vmem>>, vector<4x128xbf16>
    tpu.vector_store %arg9[%c0_2, %c0_3], %2 {strides = array<i32>} : memref<4x1024xbf16, #tpu.memory_space<vmem>>, vector<4x128xbf16>,
    %cst_4 = arith.constant 0.000000e+00 : bf16
    %4 = vector.broadcast %cst_4 : bf16 to vector<4x128xbf16>
    %c0_5 = arith.constant 0 : index
    %c896 = arith.constant 896 : index
    %5 = vector.load %arg9[%c0_5, %c896] : memref<4x1024xbf16, #tpu.memory_space<vmem>>, vector<4x128xbf16>
    tpu.vector_store %arg9[%c0_5, %c896], %4 {strides = array<i32>} : memref<4x1024xbf16, #tpu.memory_space<vmem>>, vector<4x128xbf16>,
    %c0_6 = arith.constant 0 : index
    %c0_7 = arith.constant 0 : index
    %6 = vector.load %arg0[%c0_6, %c0_7] : memref<4x768xf32, #tpu.memory_space<vmem>>, vector<4x768xf32>
    %7 = arith.truncf %6 : vector<4x768xf32> to vector<4x768xbf16>
    %c0_8 = arith.constant 0 : index
    %c128 = arith.constant 128 : index
    %8 = vector.load %arg9[%c0_8, %c128] : memref<4x1024xbf16, #tpu.memory_space<vmem>>, vector<4x768xbf16>
    tpu.vector_store %arg9[%c0_8, %c128], %7 {strides = array<i32>} : memref<4x1024xbf16, #tpu.memory_space<vmem>>, vector<4x768xbf16>,
    %c0_9 = arith.constant 0 : index
    %c109 = arith.constant 109 : index
    %9 = vector.load %arg9[%c0_9, %c109] : memref<4x1024xbf16, #tpu.memory_space<vmem>>, vector<4x768xbf16>
    %c0_10 = arith.constant 0 : index
    %c0_11 = arith.constant 0 : index
    %c0_12 = arith.constant 0 : index
    %10 = vector.load %arg1[%c0_10, %c0_11, %c0_12] : memref<9x4x4xbf16, #tpu.memory_space<vmem>>, vector<1x4x4xbf16>
    %11 = vector.shape_cast %10 : vector<1x4x4xbf16> to vector<4x4xbf16>
    %cst_13 = arith.constant dense<0.000000e+00> : vector<4x768xf32>
    %12 = tpu.matmul %11, %9, %cst_13 {dimension_numbers = #tpu.dot_dimension_numbers<[1], [0], [0], [1], [0, 0, 1, 1], [], []>} : vector<4x4xbf16>, vector<4x768xbf16>, vector<4x768xf32> -> vector<4x768xf32>
    %c0_14 = arith.constant 0 : index
    %c110 = arith.constant 110 : index
    %13 = vector.load %arg9[%c0_14, %c110] : memref<4x1024xbf16, #tpu.memory_space<vmem>>, vector<4x768xbf16>
    %c1 = arith.constant 1 : index
    %c0_15 = arith.constant 0 : index
    %c0_16 = arith.constant 0 : index
    %14 = vector.load %arg1[%c1, %c0_15, %c0_16] : memref<9x4x4xbf16, #tpu.memory_space<vmem>>, vector<1x4x4xbf16>
    %15 = vector.shape_cast %14 : vector<1x4x4xbf16> to vector<4x4xbf16>
    %cst_17 = arith.constant dense<0.000000e+00> : vector<4x768xf32>
    %16 = tpu.matmul %15, %13, %cst_17 {dimension_numbers = #tpu.dot_dimension_numbers<[1], [0], [0], [1], [0, 0, 1, 1], [], []>} : vector<4x4xbf16>, vector<4x768xbf16>, vector<4x768xf32> -> vector<4x768xf32>
    %17 = arith.addf %12, %16 : vector<4x768xf32>
    %c0_18 = arith.constant 0 : index
    %c111 = arith.constant 111 : index
    %18 = vector.load %arg9[%c0_18, %c111] : memref<4x1024xbf16, #tpu.memory_space<vmem>>, vector<4x768xbf16>
    %c2 = arith.constant 2 : index
    %c0_19 = arith.constant 0 : index
    %c0_20 = arith.constant 0 : index
    %19 = vector.load %arg1[%c2, %c0_19, %c0_20] : memref<9x4x4xbf16, #tpu.memory_space<vmem>>, vector<1x4x4xbf16>
    %20 = vector.shape_cast %19 : vector<1x4x4xbf16> to vector<4x4xbf16>
    %cst_21 = arith.constant dense<0.000000e+00> : vector<4x768xf32>
    %21 = tpu.matmul %20, %18, %cst_21 {dimension_numbers = #tpu.dot_dimension_numbers<[1], [0], [0], [1], [0, 0, 1, 1], [], []>} : vector<4x4xbf16>, vector<4x768xbf16>, vector<4x768xf32> -> vector<4x768xf32>
    %22 = arith.addf %17, %21 : vector<4x768xf32>
    %c0_22 = arith.constant 0 : index
    %c127 = arith.constant 127 : index
    %23 = vector.load %arg9[%c0_22, %c127] : memref<4x1024xbf16, #tpu.memory_space<vmem>>, vector<4x768xbf16>
    %c3 = arith.constant 3 : index
    %c0_23 = arith.constant 0 : index
    %c0_24 = arith.constant 0 : index
    %24 = vector.load %arg1[%c3, %c0_23, %c0_24] : memref<9x4x4xbf16, #tpu.memory_space<vmem>>, vector<1x4x4xbf16>
    %25 = vector.shape_cast %24 : vector<1x4x4xbf16> to vector<4x4xbf16>
    %cst_25 = arith.constant dense<0.000000e+00> : vector<4x768xf32>
    %26 = tpu.matmul %25, %23, %cst_25 {dimension_numbers = #tpu.dot_dimension_numbers<[1], [0], [0], [1], [0, 0, 1, 1], [], []>} : vector<4x4xbf16>, vector<4x768xbf16>, vector<4x768xf32> -> vector<4x768xf32>
    %27 = arith.addf %22, %26 : vector<4x768xf32>
    %c0_26 = arith.constant 0 : index
    %c128_27 = arith.constant 128 : index
    %28 = vector.load %arg9[%c0_26, %c128_27] : memref<4x1024xbf16, #tpu.memory_space<vmem>>, vector<4x768xbf16>
    %c4 = arith.constant 4 : index
    %c0_28 = arith.constant 0 : index
    %c0_29 = arith.constant 0 : index
    %29 = vector.load %arg1[%c4, %c0_28, %c0_29] : memref<9x4x4xbf16, #tpu.memory_space<vmem>>, vector<1x4x4xbf16>
    %30 = vector.shape_cast %29 : vector<1x4x4xbf16> to vector<4x4xbf16>
    %cst_30 = arith.constant dense<0.000000e+00> : vector<4x768xf32>
    %31 = tpu.matmul %30, %28, %cst_30 {dimension_numbers = #tpu.dot_dimension_numbers<[1], [0], [0], [1], [0, 0, 1, 1], [], []>} : vector<4x4xbf16>, vector<4x768xbf16>, vector<4x768xf32> -> vector<4x768xf32>
    %32 = arith.addf %27, %31 : vector<4x768xf32>
    %c0_31 = arith.constant 0 : index
    %c129 = arith.constant 129 : index
    %33 = vector.load %arg9[%c0_31, %c129] : memref<4x1024xbf16, #tpu.memory_space<vmem>>, vector<4x768xbf16>
    %c5 = arith.constant 5 : index
    %c0_32 = arith.constant 0 : index
    %c0_33 = arith.constant 0 : index
    %34 = vector.load %arg1[%c5, %c0_32, %c0_33] : memref<9x4x4xbf16, #tpu.memory_space<vmem>>, vector<1x4x4xbf16>
    %35 = vector.shape_cast %34 : vector<1x4x4xbf16> to vector<4x4xbf16>
    %cst_34 = arith.constant dense<0.000000e+00> : vector<4x768xf32>
    %36 = tpu.matmul %35, %33, %cst_34 {dimension_numbers = #tpu.dot_dimension_numbers<[1], [0], [0], [1], [0, 0, 1, 1], [], []>} : vector<4x4xbf16>, vector<4x768xbf16>, vector<4x768xf32> -> vector<4x768xf32>
    %37 = arith.addf %32, %36 : vector<4x768xf32>
    %c0_35 = arith.constant 0 : index
    %c145 = arith.constant 145 : index
    %38 = vector.load %arg9[%c0_35, %c145] : memref<4x1024xbf16, #tpu.memory_space<vmem>>, vector<4x768xbf16>
    %c6 = arith.constant 6 : index
    %c0_36 = arith.constant 0 : index
    %c0_37 = arith.constant 0 : index
    %39 = vector.load %arg1[%c6, %c0_36, %c0_37] : memref<9x4x4xbf16, #tpu.memory_space<vmem>>, vector<1x4x4xbf16>
    %40 = vector.shape_cast %39 : vector<1x4x4xbf16> to vector<4x4xbf16>
    %cst_38 = arith.constant dense<0.000000e+00> : vector<4x768xf32>
    %41 = tpu.matmul %40, %38, %cst_38 {dimension_numbers = #tpu.dot_dimension_numbers<[1], [0], [0], [1], [0, 0, 1, 1], [], []>} : vector<4x4xbf16>, vector<4x768xbf16>, vector<4x768xf32> -> vector<4x768xf32>
    %42 = arith.addf %37, %41 : vector<4x768xf32>
    %c0_39 = arith.constant 0 : index
    %c146 = arith.constant 146 : index
    %43 = vector.load %arg9[%c0_39, %c146] : memref<4x1024xbf16, #tpu.memory_space<vmem>>, vector<4x768xbf16>
    %c7 = arith.constant 7 : index
    %c0_40 = arith.constant 0 : index
    %c0_41 = arith.constant 0 : index
    %44 = vector.load %arg1[%c7, %c0_40, %c0_41] : memref<9x4x4xbf16, #tpu.memory_space<vmem>>, vector<1x4x4xbf16>
    %45 = vector.shape_cast %44 : vector<1x4x4xbf16> to vector<4x4xbf16>
    %cst_42 = arith.constant dense<0.000000e+00> : vector<4x768xf32>
    %46 = tpu.matmul %45, %43, %cst_42 {dimension_numbers = #tpu.dot_dimension_numbers<[1], [0], [0], [1], [0, 0, 1, 1], [], []>} : vector<4x4xbf16>, vector<4x768xbf16>, vector<4x768xf32> -> vector<4x768xf32>
    %47 = arith.addf %42, %46 : vector<4x768xf32>
    %c0_43 = arith.constant 0 : index
    %c147 = arith.constant 147 : index
    %48 = vector.load %arg9[%c0_43, %c147] : memref<4x1024xbf16, #tpu.memory_space<vmem>>, vector<4x768xbf16>
    %c8 = arith.constant 8 : index
    %c0_44 = arith.constant 0 : index
    %c0_45 = arith.constant 0 : index
    %49 = vector.load %arg1[%c8, %c0_44, %c0_45] : memref<9x4x4xbf16, #tpu.memory_space<vmem>>, vector<1x4x4xbf16>
    %50 = vector.shape_cast %49 : vector<1x4x4xbf16> to vector<4x4xbf16>
    %cst_46 = arith.constant dense<0.000000e+00> : vector<4x768xf32>
    %51 = tpu.matmul %50, %48, %cst_46 {dimension_numbers = #tpu.dot_dimension_numbers<[1], [0], [0], [1], [0, 0, 1, 1], [], []>} : vector<4x4xbf16>, vector<4x768xbf16>, vector<4x768xf32> -> vector<4x768xf32>
    %52 = arith.addf %47, %51 : vector<4x768xf32>
    %53 = vector.broadcast %0 : vector<1x768xf32> to vector<4x768xf32>
    %54 = arith.mulf %52, %53 : vector<4x768xf32>
    %cst_47 = arith.constant dense<0.000000e+00> : vector<4xf32>
    %55 = vector.multi_reduction <add>, %54, %cst_47 [1] : vector<4x768xf32> to vector<4xf32>
    %56 = vector.shape_cast %55 : vector<4xf32> to vector<4x1xf32>
    %57 = arith.mulf %54, %52 : vector<4x768xf32>
    %cst_48 = arith.constant dense<0.000000e+00> : vector<4xf32>
    %58 = vector.multi_reduction <add>, %57, %cst_48 [1] : vector<4x768xf32> to vector<4xf32>
    %59 = vector.shape_cast %58 : vector<4xf32> to vector<4x1xf32>
    %cst_49 = arith.constant 0.001953125 : f32
    %60 = vector.broadcast %cst_49 : f32 to vector<4x1xf32>
    %61 = arith.mulf %56, %60 : vector<4x1xf32>
    %cst_50 = arith.constant 0.001953125 : f32
    %62 = vector.broadcast %cst_50 : f32 to vector<4x1xf32>
    %63 = arith.mulf %59, %62 : vector<4x1xf32>
    %64 = arith.mulf %61, %61 : vector<4x1xf32>
    %65 = arith.subf %63, %64 : vector<4x1xf32>
    %cst_51 = arith.constant 0.000000e+00 : f32
    %66 = vector.broadcast %cst_51 : f32 to vector<4x1xf32>
    %67 = arith.maximumf %65, %66 : vector<4x1xf32>
    %c0_52 = arith.constant 0 : index
    %c0_53 = arith.constant 0 : index
    %68 = vector.load %arg3[%c0_52, %c0_53] : memref<4x1xf32, #tpu.memory_space<vmem>>, vector<4x1xf32>
    %69 = vector.broadcast %61 : vector<4x1xf32> to vector<4x768xf32>
    %70 = arith.subf %52, %69 : vector<4x768xf32>
    %71 = vector.broadcast %68 : vector<4x1xf32> to vector<4x768xf32>
    %72 = arith.mulf %71, %70 : vector<4x768xf32>
    %cst_54 = arith.constant 9.99999974E-6 : f32
    %73 = vector.broadcast %cst_54 : f32 to vector<4x1xf32>
    %74 = arith.addf %67, %73 : vector<4x1xf32>
    %75 = math.rsqrt %74 : vector<4x1xf32>
    %76 = vector.broadcast %75 : vector<4x1xf32> to vector<4x768xf32>
    %77 = arith.mulf %72, %76 : vector<4x768xf32>
    %c0_55 = arith.constant 0 : index
    %c0_56 = arith.constant 0 : index
    %78 = vector.load %arg4[%c0_55, %c0_56] : memref<4x1xf32, #tpu.memory_space<vmem>>, vector<4x1xf32>
    %79 = vector.broadcast %78 : vector<4x1xf32> to vector<4x768xf32>
    %80 = arith.addf %77, %79 : vector<4x768xf32>
    %cst_57 = arith.constant 0.000000e+00 : f32
    %81 = vector.broadcast %cst_57 : f32 to vector<4x768xf32>
    %82 = arith.cmpf ogt, %80, %81 : vector<4x768xf32>
    %83 = vector.broadcast %1 : f32 to vector<4x768xf32>
    %84 = arith.mulf %83, %80 : vector<4x768xf32>
    %85 = arith.select %82, %80, %84 : vector<4x768xi1>, vector<4x768xf32>
    %86 = vector.broadcast %0 : vector<1x768xf32> to vector<4x768xf32>
    %87 = arith.mulf %85, %86 : vector<4x768xf32>
    %88 = arith.truncf %87 : vector<4x768xf32> to vector<4x768xbf16>
    %c0_58 = arith.constant 0 : index
    %c128_59 = arith.constant 128 : index
    %89 = vector.load %arg9[%c0_58, %c128_59] : memref<4x1024xbf16, #tpu.memory_space<vmem>>, vector<4x768xbf16>
    tpu.vector_store %arg9[%c0_58, %c128_59], %88 {strides = array<i32>} : memref<4x1024xbf16, #tpu.memory_space<vmem>>, vector<4x768xbf16>,
    %c0_60 = arith.constant 0 : index
    %c109_61 = arith.constant 109 : index
    %90 = vector.load %arg9[%c0_60, %c109_61] : memref<4x1024xbf16, #tpu.memory_space<vmem>>, vector<4x768xbf16>
    %c0_62 = arith.constant 0 : index
    %c0_63 = arith.constant 0 : index
    %c0_64 = arith.constant 0 : index
    %91 = vector.load %arg2[%c0_62, %c0_63, %c0_64] : memref<9x4x4xbf16, #tpu.memory_space<vmem>>, vector<1x4x4xbf16>
    %92 = vector.shape_cast %91 : vector<1x4x4xbf16> to vector<4x4xbf16>
    %cst_65 = arith.constant dense<0.000000e+00> : vector<4x768xf32>
    %93 = tpu.matmul %92, %90, %cst_65 {dimension_numbers = #tpu.dot_dimension_numbers<[1], [0], [0], [1], [0, 0, 1, 1], [], []>} : vector<4x4xbf16>, vector<4x768xbf16>, vector<4x768xf32> -> vector<4x768xf32>
    %c0_66 = arith.constant 0 : index
    %c110_67 = arith.constant 110 : index
    %94 = vector.load %arg9[%c0_66, %c110_67] : memref<4x1024xbf16, #tpu.memory_space<vmem>>, vector<4x768xbf16>
    %c1_68 = arith.constant 1 : index
    %c0_69 = arith.constant 0 : index
    %c0_70 = arith.constant 0 : index
    %95 = vector.load %arg2[%c1_68, %c0_69, %c0_70] : memref<9x4x4xbf16, #tpu.memory_space<vmem>>, vector<1x4x4xbf16>
    %96 = vector.shape_cast %95 : vector<1x4x4xbf16> to vector<4x4xbf16>
    %cst_71 = arith.constant dense<0.000000e+00> : vector<4x768xf32>
    %97 = tpu.matmul %96, %94, %cst_71 {dimension_numbers = #tpu.dot_dimension_numbers<[1], [0], [0], [1], [0, 0, 1, 1], [], []>} : vector<4x4xbf16>, vector<4x768xbf16>, vector<4x768xf32> -> vector<4x768xf32>
    %98 = arith.addf %93, %97 : vector<4x768xf32>
    %c0_72 = arith.constant 0 : index
    %c111_73 = arith.constant 111 : index
    %99 = vector.load %arg9[%c0_72, %c111_73] : memref<4x1024xbf16, #tpu.memory_space<vmem>>, vector<4x768xbf16>
    %c2_74 = arith.constant 2 : index
    %c0_75 = arith.constant 0 : index
    %c0_76 = arith.constant 0 : index
    %100 = vector.load %arg2[%c2_74, %c0_75, %c0_76] : memref<9x4x4xbf16, #tpu.memory_space<vmem>>, vector<1x4x4xbf16>
    %101 = vector.shape_cast %100 : vector<1x4x4xbf16> to vector<4x4xbf16>
    %cst_77 = arith.constant dense<0.000000e+00> : vector<4x768xf32>
    %102 = tpu.matmul %101, %99, %cst_77 {dimension_numbers = #tpu.dot_dimension_numbers<[1], [0], [0], [1], [0, 0, 1, 1], [], []>} : vector<4x4xbf16>, vector<4x768xbf16>, vector<4x768xf32> -> vector<4x768xf32>
    %103 = arith.addf %98, %102 : vector<4x768xf32>
    %c0_78 = arith.constant 0 : index
    %c127_79 = arith.constant 127 : index
    %104 = vector.load %arg9[%c0_78, %c127_79] : memref<4x1024xbf16, #tpu.memory_space<vmem>>, vector<4x768xbf16>
    %c3_80 = arith.constant 3 : index
    %c0_81 = arith.constant 0 : index
    %c0_82 = arith.constant 0 : index
    %105 = vector.load %arg2[%c3_80, %c0_81, %c0_82] : memref<9x4x4xbf16, #tpu.memory_space<vmem>>, vector<1x4x4xbf16>
    %106 = vector.shape_cast %105 : vector<1x4x4xbf16> to vector<4x4xbf16>
    %cst_83 = arith.constant dense<0.000000e+00> : vector<4x768xf32>
    %107 = tpu.matmul %106, %104, %cst_83 {dimension_numbers = #tpu.dot_dimension_numbers<[1], [0], [0], [1], [0, 0, 1, 1], [], []>} : vector<4x4xbf16>, vector<4x768xbf16>, vector<4x768xf32> -> vector<4x768xf32>
    %108 = arith.addf %103, %107 : vector<4x768xf32>
    %c0_84 = arith.constant 0 : index
    %c128_85 = arith.constant 128 : index
    %109 = vector.load %arg9[%c0_84, %c128_85] : memref<4x1024xbf16, #tpu.memory_space<vmem>>, vector<4x768xbf16>
    %c4_86 = arith.constant 4 : index
    %c0_87 = arith.constant 0 : index
    %c0_88 = arith.constant 0 : index
    %110 = vector.load %arg2[%c4_86, %c0_87, %c0_88] : memref<9x4x4xbf16, #tpu.memory_space<vmem>>, vector<1x4x4xbf16>
    %111 = vector.shape_cast %110 : vector<1x4x4xbf16> to vector<4x4xbf16>
    %cst_89 = arith.constant dense<0.000000e+00> : vector<4x768xf32>
    %112 = tpu.matmul %111, %109, %cst_89 {dimension_numbers = #tpu.dot_dimension_numbers<[1], [0], [0], [1], [0, 0, 1, 1], [], []>} : vector<4x4xbf16>, vector<4x768xbf16>, vector<4x768xf32> -> vector<4x768xf32>
    %113 = arith.addf %108, %112 : vector<4x768xf32>
    %c0_90 = arith.constant 0 : index
    %c129_91 = arith.constant 129 : index
    %114 = vector.load %arg9[%c0_90, %c129_91] : memref<4x1024xbf16, #tpu.memory_space<vmem>>, vector<4x768xbf16>
    %c5_92 = arith.constant 5 : index
    %c0_93 = arith.constant 0 : index
    %c0_94 = arith.constant 0 : index
    %115 = vector.load %arg2[%c5_92, %c0_93, %c0_94] : memref<9x4x4xbf16, #tpu.memory_space<vmem>>, vector<1x4x4xbf16>
    %116 = vector.shape_cast %115 : vector<1x4x4xbf16> to vector<4x4xbf16>
    %cst_95 = arith.constant dense<0.000000e+00> : vector<4x768xf32>
    %117 = tpu.matmul %116, %114, %cst_95 {dimension_numbers = #tpu.dot_dimension_numbers<[1], [0], [0], [1], [0, 0, 1, 1], [], []>} : vector<4x4xbf16>, vector<4x768xbf16>, vector<4x768xf32> -> vector<4x768xf32>
    %118 = arith.addf %113, %117 : vector<4x768xf32>
    %c0_96 = arith.constant 0 : index
    %c145_97 = arith.constant 145 : index
    %119 = vector.load %arg9[%c0_96, %c145_97] : memref<4x1024xbf16, #tpu.memory_space<vmem>>, vector<4x768xbf16>
    %c6_98 = arith.constant 6 : index
    %c0_99 = arith.constant 0 : index
    %c0_100 = arith.constant 0 : index
    %120 = vector.load %arg2[%c6_98, %c0_99, %c0_100] : memref<9x4x4xbf16, #tpu.memory_space<vmem>>, vector<1x4x4xbf16>
    %121 = vector.shape_cast %120 : vector<1x4x4xbf16> to vector<4x4xbf16>
    %cst_101 = arith.constant dense<0.000000e+00> : vector<4x768xf32>
    %122 = tpu.matmul %121, %119, %cst_101 {dimension_numbers = #tpu.dot_dimension_numbers<[1], [0], [0], [1], [0, 0, 1, 1], [], []>} : vector<4x4xbf16>, vector<4x768xbf16>, vector<4x768xf32> -> vector<4x768xf32>
    %123 = arith.addf %118, %122 : vector<4x768xf32>
    %c0_102 = arith.constant 0 : index
    %c146_103 = arith.constant 146 : index
    %124 = vector.load %arg9[%c0_102, %c146_103] : memref<4x1024xbf16, #tpu.memory_space<vmem>>, vector<4x768xbf16>
    %c7_104 = arith.constant 7 : index
    %c0_105 = arith.constant 0 : index
    %c0_106 = arith.constant 0 : index
    %125 = vector.load %arg2[%c7_104, %c0_105, %c0_106] : memref<9x4x4xbf16, #tpu.memory_space<vmem>>, vector<1x4x4xbf16>
    %126 = vector.shape_cast %125 : vector<1x4x4xbf16> to vector<4x4xbf16>
    %cst_107 = arith.constant dense<0.000000e+00> : vector<4x768xf32>
    %127 = tpu.matmul %126, %124, %cst_107 {dimension_numbers = #tpu.dot_dimension_numbers<[1], [0], [0], [1], [0, 0, 1, 1], [], []>} : vector<4x4xbf16>, vector<4x768xbf16>, vector<4x768xf32> -> vector<4x768xf32>
    %128 = arith.addf %123, %127 : vector<4x768xf32>
    %c0_108 = arith.constant 0 : index
    %c147_109 = arith.constant 147 : index
    %129 = vector.load %arg9[%c0_108, %c147_109] : memref<4x1024xbf16, #tpu.memory_space<vmem>>, vector<4x768xbf16>
    %c8_110 = arith.constant 8 : index
    %c0_111 = arith.constant 0 : index
    %c0_112 = arith.constant 0 : index
    %130 = vector.load %arg2[%c8_110, %c0_111, %c0_112] : memref<9x4x4xbf16, #tpu.memory_space<vmem>>, vector<1x4x4xbf16>
    %131 = vector.shape_cast %130 : vector<1x4x4xbf16> to vector<4x4xbf16>
    %cst_113 = arith.constant dense<0.000000e+00> : vector<4x768xf32>
    %132 = tpu.matmul %131, %129, %cst_113 {dimension_numbers = #tpu.dot_dimension_numbers<[1], [0], [0], [1], [0, 0, 1, 1], [], []>} : vector<4x4xbf16>, vector<4x768xbf16>, vector<4x768xf32> -> vector<4x768xf32>
    %133 = arith.addf %128, %132 : vector<4x768xf32>
    %134 = vector.broadcast %0 : vector<1x768xf32> to vector<4x768xf32>
    %135 = arith.mulf %133, %134 : vector<4x768xf32>
    %cst_114 = arith.constant dense<0.000000e+00> : vector<4xf32>
    %136 = vector.multi_reduction <add>, %135, %cst_114 [1] : vector<4x768xf32> to vector<4xf32>
    %137 = vector.shape_cast %136 : vector<4xf32> to vector<4x1xf32>
    %138 = arith.mulf %135, %133 : vector<4x768xf32>
    %cst_115 = arith.constant dense<0.000000e+00> : vector<4xf32>
    %139 = vector.multi_reduction <add>, %138, %cst_115 [1] : vector<4x768xf32> to vector<4xf32>
    %140 = vector.shape_cast %139 : vector<4xf32> to vector<4x1xf32>
    %cst_116 = arith.constant 0.001953125 : f32
    %141 = vector.broadcast %cst_116 : f32 to vector<4x1xf32>
    %142 = arith.mulf %137, %141 : vector<4x1xf32>
    %cst_117 = arith.constant 0.001953125 : f32
    %143 = vector.broadcast %cst_117 : f32 to vector<4x1xf32>
    %144 = arith.mulf %140, %143 : vector<4x1xf32>
    %145 = arith.mulf %142, %142 : vector<4x1xf32>
    %146 = arith.subf %144, %145 : vector<4x1xf32>
    %cst_118 = arith.constant 0.000000e+00 : f32
    %147 = vector.broadcast %cst_118 : f32 to vector<4x1xf32>
    %148 = arith.maximumf %146, %147 : vector<4x1xf32>
    %c0_119 = arith.constant 0 : index
    %c0_120 = arith.constant 0 : index
    %149 = vector.load %arg3[%c0_119, %c0_120] : memref<4x1xf32, #tpu.memory_space<vmem>>, vector<4x1xf32>
    %150 = vector.broadcast %142 : vector<4x1xf32> to vector<4x768xf32>
    %151 = arith.subf %133, %150 : vector<4x768xf32>
    %152 = vector.broadcast %149 : vector<4x1xf32> to vector<4x768xf32>
    %153 = arith.mulf %152, %151 : vector<4x768xf32>
    %cst_121 = arith.constant 9.99999974E-6 : f32
    %154 = vector.broadcast %cst_121 : f32 to vector<4x1xf32>
    %155 = arith.addf %148, %154 : vector<4x1xf32>
    %156 = math.rsqrt %155 : vector<4x1xf32>
    %157 = vector.broadcast %156 : vector<4x1xf32> to vector<4x768xf32>
    %158 = arith.mulf %153, %157 : vector<4x768xf32>
    %c0_122 = arith.constant 0 : index
    %c0_123 = arith.constant 0 : index
    %159 = vector.load %arg4[%c0_122, %c0_123] : memref<4x1xf32, #tpu.memory_space<vmem>>, vector<4x1xf32>
    %160 = vector.broadcast %159 : vector<4x1xf32> to vector<4x768xf32>
    %161 = arith.addf %158, %160 : vector<4x768xf32>
    %cst_124 = arith.constant 0.000000e+00 : f32
    %162 = vector.broadcast %cst_124 : f32 to vector<4x768xf32>
    %163 = arith.cmpf ogt, %161, %162 : vector<4x768xf32>
    %164 = vector.broadcast %1 : f32 to vector<4x768xf32>
    %165 = arith.mulf %164, %161 : vector<4x768xf32>
    %166 = arith.select %163, %161, %165 : vector<4x768xi1>, vector<4x768xf32>
    %c0_125 = arith.constant 0 : index
    %167 = memref.load %arg7[%c0_125] : memref<1xf32, #tpu.memory_space<smem>>
    %168 = vector.broadcast %167 : f32 to vector<4x768xf32>
    %169 = arith.mulf %166, %168 : vector<4x768xf32>
    %c0_126 = arith.constant 0 : index
    %c0_127 = arith.constant 0 : index
    %170 = vector.load %arg0[%c0_126, %c0_127] : memref<4x768xf32, #tpu.memory_space<vmem>>, vector<4x768xf32>
    %171 = arith.addf %169, %170 : vector<4x768xf32>
    %c0_128 = arith.constant 0 : index
    %c0_129 = arith.constant 0 : index
    %172 = vector.load %arg8[%c0_128, %c0_129] : memref<4x768xf32, #tpu.memory_space<vmem>>, vector<4x768xf32>
    tpu.vector_store %arg8[%c0_128, %c0_129], %171 {strides = array<i32>} : memref<4x768xf32, #tpu.memory_space<vmem>>, vector<4x768xf32>,
    return
  }
}

</mosaic_0001>

<bundles_post_ra>
// kernel: tpu_custom_call.1
= control target key start
LH: loop header
LB: loop body
LE: loop exit
PB: predicated region body
PF: predicated region fallthrough
CT: control target
= control target key end

     0   :  { %v66_v2 = vlaneseq  ;;  %v4430_v3 = vmov 0   ;;  %v4431_v6 = vmov 1983009808   ;;  %s5224_s0 = inlined_call_operand.vmem [shape: f32[4,768], index: 0, kind: input, shape index: {}]   ;;  %s5225_s1 = inlined_call_operand.vmem [shape: bf16[9,4,4], index: 1, kind: input, shape index: {}]   ;;  %s5226_s2 = inlined_call_operand.vmem [shape: bf16[9,4,4], index: 2, kind: input, shape index: {}]   ;;  %s5227_s3 = inlined_call_operand.vmem [shape: f32[4,1], index: 3, kind: input, shape index: {}]   ;;  %s5228_s4 = inlined_call_operand.vmem [shape: f32[4,1], index: 4, kind: input, shape index: {}]   ;;  %s5229_s5 = inlined_call_operand.vmem [shape: f32[1,768], index: 5, kind: input, shape index: {}]   ;;  %s5230_s6 = inlined_call_operand.<no memory space> [shape: f32[1], index: 6, kind: input, shape index: {}]   ;;  %s5231_s7 = inlined_call_operand.<no memory space> [shape: f32[1], index: 7, kind: input, shape index: {}]   ;;  %s5232_s8 = inlined_call_operand.hbm [shape: f32[4,768], index: 8, kind: output, shape index: {}]  }
   0x1   :  { %v37_v0 = vld [vmem:[%s5224_s0] sm:$0xff]  ;;  %v38_v1 = vld [vmem:[%s5224_s0 + $0x8] sm:$0xff]  ;;  %35 = vst [vmem:[#allocation2] sm:$0x3] %v4430_v3  ;;  %v64_v7 = vunpack.c.l.s4 %v4431_v6  ;;  %36 = vst [vmem:[#allocation2 + $0xe] sm:$0x3] %v4430_v3  ;;  %206 = vmatprep.mubr.bf16.mxu0 %v4430_v3  ;;  %4376 = vset.pattern.permute.xlu0 %v4430_v3 }
   0x2   :  { %v43_v4 = vcombine.high %v37_v0, %v37_v0  ;;  %v44_v5 = vcombine.high %v38_v1, %v38_v1  ;;  %v39_v8 = vld [vmem:[%s5224_s0 + $0x10] sm:$0xff] }
   0x3   :  { %15 = vsyncpa [#allocation6], 0  ;;  %v4499_v9 = vshrl.u32 %v66_v2, 7  ;;  %v45_v10 = vcombine.high %v39_v8, %v39_v8  ;;  %4377 = vset.pattern.permute.xlu1 %v4430_v3  ;;  %2195 = vmatprep.mubr.bf16.mxu1 %v4430_v3  ;;  %v65_v13 = vunpack.c.0.s8 %v64_v7  ;;  %s4432_s11 = smov 18   ;;  %s4433_s12 = smov 19   ;;  %vm144_vm0 = vcmask 146432  }
   0x4   :  { %v4039_v11 = vpack.c.bf16 %v43_v4, %v37_v0  ;;  %v4040_v12 = vpack.c.bf16 %v44_v5, %v38_v1  ;;  %s4434_s13 = smov 17   ;;  %s4435_s14 = smov 1   ;;  %vm155_vm1 = vcmask 1041408   ;;  %vm151_vm2 = vcmask 31744  }
   0x5   :  { %v4041_v14 = vpack.c.bf16 %v45_v10, %v39_v8  ;;  %v4504_v15 = vsub.s32 %v65_v13, %v4499_v9  ;;  %s4436_s15 = smov 127   ;;  %s4437_s16 = smov 111   ;;  %vm311_vm3 = vcmask 154624   ;;  %vm515_vm4 = vcmask 138240  }
   0x6   :  { %s4438_s17 = smov 110   ;;  %s4439_s18 = smov 109   ;;  %vm725_vm5 = vcmask 7168   ;;  %vm1116_vm6 = vcmask 1039360   ;;  %vm1326_vm7 = vcmask 908288   ;;  %vm1536_vm8 = vcmask 900096  }
   0x7   :  { %4042 = vst.sshfl [vmem:[#allocation2 + $0xa] sm:$0x33 pattern:$0x76325410] %v4041_v14  ;;  %v69_v16 = vrot.slane %v4039_v11, %v4504_v15  ;;  %v76_v17 = vrot.slane %v4040_v12, %v4504_v15  ;;  %v4043_v11 = vld [vmem:[%s5225_s1 + $0x2] sm:$0x3] }
   0x8   :  { %vm1746_vm9 = vcmask 891904   ;;  %vm5233_vm10 = vcmask 1043456  }
   0x9   :  { %v77_v18 = vcombine.low %v69_v16, %v76_v17  ;;  %v4404_v41 = vcombine.low %v76_v17, %v76_v17 }
   0xb   :  { %88 = vst [vmem:[#allocation2 + $0x2] sm:$0xff] %v77_v18  ;;  %v4544_v40 = vrot.slane %v77_v18, %v4504_v15  ;;  %v4554_v43 = vrot.slane %v4404_v41, %v4504_v15 }
   0xd   :  { %v4549_v42 = vcombine.high %v4544_v40, %v4544_v40  ;;  %v4560_v45 = vcombine.high %v4554_v43, %v4554_v43 }
   0xe   :  { %v1064_v44 = vld [vmem:[#allocation2 + $0xa] sm:$0x3f] }
   0xf   :  { %v1093_v46 = vrot.slane %v1064_v44, %v4504_v15  ;;  %v1086_v47 = vcombine.high %v1064_v44, %v1064_v44  ;;  %v1274_v50 = vld [vmem:[#allocation2 + $0xa] sm:$0x3f] }
  0x10   :  { %v1303_v51 = vrot.slane %v1274_v50, %v4504_v15  ;;  %v1296_v52 = vcombine.high %v1274_v50, %v1274_v50  ;;  %v1484_v55 = vld [vmem:[#allocation2 + $0xa] sm:$0x3f] }
  0x11   :  { %v1101_v48 = vcombine.high %v1093_v46, %v1093_v46  ;;  %v1100_v49 = vrot.slane %v1086_v47, %v4504_v15  ;;  %v1513_v56 = vrot.slane %v1484_v55, %v4504_v15  ;;  %v1506_v57 = vcombine.high %v1484_v55, %v1484_v55  ;;  %v1694_v60 = vld [vmem:[#allocation2 + $0xa] sm:$0x3f] }
  0x12   :  { %v90_v19 = vld [vmem:[#allocation2] sm:$0xff]  ;;  %v91_v24 = vld [vmem:[#allocation2 + $0x8] sm:$0x3f]  ;;  %v1311_v53 = vcombine.high %v1303_v51, %v1303_v51  ;;  %v1310_v54 = vrot.slane %v1296_v52, %v4504_v15  ;;  %v1723_v61 = vrot.slane %v1694_v60, %v4504_v15  ;;  %v1716_v62 = vcombine.high %v1694_v60, %v1694_v60 }
  0x13   :  { %v104_v20 = vrot.slane %v90_v19, %v4504_v15  ;;  %v97_v21 = vcombine.high %v90_v19, %v90_v19  ;;  %v121_v26 = vrot.slane %v91_v24, %v4504_v15  ;;  %v114_v27 = vcombine.high %v91_v24, %v91_v24  ;;  %v463_v30 = vld [vmem:[#allocation2 + $0x8] sm:$0x3f] }
  0x14   :  { %v492_v31 = vrot.slane %v463_v30, %v4504_v15  ;;  %v485_v32 = vcombine.high %v463_v30, %v463_v30  ;;  %v673_v35 = vld [vmem:[#allocation2 + $0x8] sm:$0x3f]  ;;  %v1521_v58 = vcombine.high %v1513_v56, %v1513_v56  ;;  %v1520_v59 = vrot.slane %v1506_v57, %v4504_v15 }
  0x15   :  { %130 = vrot.lane.b32.xlu0 %v104_v20, %s4432_s11  ;;  %v111_v22 = vrot.slane %v97_v21, %v4504_v15  ;;  %v112_v23 = vcombine.high %v104_v20, %v104_v20  ;;  %v129_v28 = vcombine.high %v121_v26, %v121_v26  ;;  %v128_v29 = vrot.slane %v114_v27, %v4504_v15 }
  0x16   :  { %v500_v33 = vcombine.high %v492_v31, %v492_v31  ;;  %v499_v34 = vrot.slane %v485_v32, %v4504_v15  ;;  %v702_v36 = vrot.slane %v673_v35, %v4504_v15  ;;  %v695_v37 = vcombine.high %v673_v35, %v673_v35 }
  0x17   :  { %134 = vrot.lane.b32.xlu1 %v111_v22, %s4432_s11  ;;  %v113_v25 = vcombine.high %v111_v22, %v111_v22  ;;  %v1731_v63 = vcombine.high %v1723_v61, %v1723_v61  ;;  %v1730_v0 = vrot.slane %v1716_v62, %v4504_v15 }
  0x18   :  { %v710_v38 = vcombine.high %v702_v36, %v702_v36  ;;  %v709_v39 = vrot.slane %v695_v37, %v4504_v15 }
  0x19   :  { %132 = vrot.lane.b32.xlu0 %v112_v23, %s4432_s11 }
  0x1b   :  { %136 = vrot.lane.b32.xlu1 %v113_v25, %s4432_s11 }
  0x1d   :  { %138 = vrot.lane.b32.xlu0 %v121_v26, %s4432_s11 }
  0x1f   :  { %140 = vrot.lane.b32.xlu1 %v129_v28, %s4432_s11 }
  0x21   :  { %142 = vrot.lane.b32.xlu0 %v128_v29, %s4432_s11 }
  0x23   :  { %297 = vrot.lane.b32.xlu1 %v104_v20, %s4433_s12 }
  0x25   :  { %299 = vrot.lane.b32.xlu0 %v112_v23, %s4433_s12 }
  0x27   :  { %301 = vrot.lane.b32.xlu1 %v111_v22, %s4433_s12 }
  0x29   :  { %303 = vrot.lane.b32.xlu0 %v113_v25, %s4433_s12 }
  0x2b   :  { %305 = vrot.lane.b32.xlu1 %v121_v26, %s4433_s12 }
  0x2d   :  { %307 = vrot.lane.b32.xlu0 %v129_v28, %s4433_s12 }
  0x2f   :  { %309 = vrot.lane.b32.xlu1 %v128_v29, %s4433_s12 }
  0x31   :  { %501 = vrot.lane.b32.xlu0 %v104_v20, %s4434_s13 }
  0x33   :  { %503 = vrot.lane.b32.xlu1 %v112_v23, %s4434_s13 }
  0x35   :  { %505 = vrot.lane.b32.xlu0 %v111_v22, %s4434_s13 }
  0x37   :  { %507 = vrot.lane.b32.xlu1 %v113_v25, %s4434_s13 }
  0x39   :  { %509 = vrot.lane.b32.xlu0 %v492_v31, %s4434_s13 }
  0x3b   :  { %511 = vrot.lane.b32.xlu1 %v500_v33, %s4434_s13  ;;  %v92_v33 = vld [vmem:[%s5225_s1] sm:$0x3] }
  0x3d   :  { %513 = vrot.lane.b32.xlu0 %v499_v34, %s4434_s13 }
  0x3f   :  { %711 = vrot.lane.b32.xlu1 %v104_v20, %s4435_s14 }
  0x41   :  { %713 = vrot.lane.b32.xlu0 %v112_v23, %s4435_s14 }
  0x43   :  { %715 = vrot.lane.b32.xlu1 %v111_v22, %s4435_s14 }
  0x45   :  { %717 = vrot.lane.b32.xlu0 %v113_v25, %s4435_s14 }
  0x47   :  { %719 = vrot.lane.b32.xlu1 %v702_v36, %s4435_s14 }
  0x49   :  { %721 = vrot.lane.b32.xlu0 %v710_v38, %s4435_s14 }
  0x4b   :  { %723 = vrot.lane.b32.xlu1 %v709_v39, %s4435_s14 }
  0x4d   :  { %1102 = vrot.lane.b32.xlu0 %v4544_v40, %s4436_s15 }
  0x4f   :  { %1104 = vrot.lane.b32.xlu1 %v4549_v42, %s4436_s15 }
  0x51   :  { %1106 = vrot.lane.b32.xlu0 %v4554_v43, %s4436_s15 }
  0x53   :  { %1108 = vrot.lane.b32.xlu1 %v4560_v45, %s4436_s15 }
  0x55   :  { %1110 = vrot.lane.b32.xlu0 %v1093_v46, %s4436_s15 }
  0x57   :  { %1112 = vrot.lane.b32.xlu1 %v1101_v48, %s4436_s15 }
  0x59   :  { %1114 = vrot.lane.b32.xlu0 %v1100_v49, %s4436_s15 }
  0x5b   :  { %1312 = vrot.lane.b32.xlu1 %v4544_v40, %s4437_s16 }
  0x5d   :  { %1314 = vrot.lane.b32.xlu0 %v4549_v42, %s4437_s16 }
  0x5f   :  { %1316 = vrot.lane.b32.xlu1 %v4554_v43, %s4437_s16 }
  0x61   :  { %1318 = vrot.lane.b32.xlu0 %v4560_v45, %s4437_s16 }
  0x63   :  { %1320 = vrot.lane.b32.xlu1 %v1303_v51, %s4437_s16 }
  0x65   :  { %1322 = vrot.lane.b32.xlu0 %v1311_v53, %s4437_s16 }
  0x67   :  { %1324 = vrot.lane.b32.xlu1 %v1310_v54, %s4437_s16  ;;  %v4056_v54 = vld [vmem:[%s5225_s1 + $0x4] sm:$0x3] }
  0x69   :  { %1522 = vrot.lane.b32.xlu0 %v4544_v40, %s4438_s17 }
  0x6b   :  { %1524 = vrot.lane.b32.xlu1 %v4549_v42, %s4438_s17 }
  0x6d   :  { %1526 = vrot.lane.b32.xlu0 %v4554_v43, %s4438_s17 }
  0x6f   :  { %1528 = vrot.lane.b32.xlu1 %v4560_v45, %s4438_s17 }
  0x71   :  { %1530 = vrot.lane.b32.xlu0 %v1513_v56, %s4438_s17 }
  0x73   :  { %1532 = vrot.lane.b32.xlu1 %v1521_v58, %s4438_s17 }
  0x75   :  { %1534 = vrot.lane.b32.xlu0 %v1520_v59, %s4438_s17 }
  0x77   :  { %1732 = vrot.lane.b32.xlu1 %v4544_v40, %s4439_s18 }
  0x79   :  { %1734 = vrot.lane.b32.xlu0 %v4549_v42, %s4439_s18 }
  0x7b   :  { %1736 = vrot.lane.b32.xlu1 %v4554_v43, %s4439_s18 }
  0x7d   :  { %1738 = vrot.lane.b32.xlu0 %v4560_v45, %s4439_s18 }
  0x7f   :  { %1740 = vrot.lane.b32.xlu1 %v1723_v61, %s4439_s18 }
  0x81   :  { %1742 = vrot.lane.b32.xlu0 %v1731_v63, %s4439_s18 }
  0x83   :  { %1744 = vrot.lane.b32.xlu1 %v1730_v0, %s4439_s18 }
  0x87   :  { %v131_v1 = vpop.permute.xlu0 %130 }
  0x89   :  { %v135_v2 = vpop.permute.xlu1 %134 }
  0x8b   :  { %v133_v4 = vpop.permute.xlu0 %132 }
  0x8c   :  { %v146_v5 = vsel %vm144_vm0, %v133_v4, %v135_v2  ;;  %v145_v6 = vsel %vm144_vm0, %v131_v1, %v133_v4 }
  0x8d   :  { %4044 = vmatprep.subr.msk.bf16.mxu0 %vm155_vm1, %v146_v5  ;;  %v137_v7 = vpop.permute.xlu1 %136  ;;  %v157_v8 = vsel %vm155_vm1, %v145_v6, 0 }
  0x8e   :  { %v147_v10 = vsel %vm144_vm0, %v135_v2, %v137_v7  ;;  %175 = vmatpush1.bf16.msra.mxu0 %v157_v8 }
  0x8f   :  { %v139_v12 = vpop.permute.xlu0 %138  ;;  %v163_v14 = vsel %vm155_vm1, %v147_v10, 0 }
  0x90   :  { %v148_v13 = vsel %vm144_vm0, %v137_v7, %v139_v12  ;;  %v4063_v7 = vld [vmem:[%s5225_s1 + $0x6] sm:$0x3] }
  0x91   :  { %4045 = vmatmul.mubr.msk.bf16.vlgmr.msra.gmra.mrb[0].mxu0 %vm151_vm2, %v4043_v11  ;;  %4046 = vmatprep.subr.msk.bf16.mxu0 %vm155_vm1, %v148_v13  ;;  %v141_v16 = vpop.permute.xlu1 %140 }
  0x92   :  { %216 = vmatpush1.bf16.msra.mxu0 %v163_v14  ;;  %247 = vmatprep.mubr.bf16.mxu0 %v4430_v3  ;;  %v149_v20 = vsel %vm144_vm0, %v139_v12, %v141_v16  ;;  %v917_v14 = vsel %vm155_vm1, %v4544_v40, 0 }
  0x93   :  { %v143_v17 = vpop.permute.xlu0 %142  ;;  %v169_v22 = vsel %vm155_vm1, %v149_v20, 0 }
  0x94   :  { %v150_v18 = vsel %vm144_vm0, %v141_v16, %v143_v17  ;;  %v4071_v16 = vld.sshfl [vmem:[#allocation2 + $0xa] sm:$0x33 pattern:$0x76325410]  ;;  %v4070_v17 = vld [vmem:[%s5225_s1 + $0x8] sm:$0x3] }
  0x95   :  { %4048 = vmatprep.subr.msk.bf16.mxu0 %vm155_vm1, %v150_v18  ;;  %v298_v19 = vpop.permute.xlu1 %297  ;;  %v923_v18 = vsel %vm155_vm1, %v4554_v43, 0  ;;  %v929_v20 = vsel %vm155_vm1, %v4071_v16, 0 }
  0x97   :  { %v300_v21 = vpop.permute.xlu0 %299 }
  0x98   :  { %v312_v25 = vsel %vm311_vm3, %v298_v19, %v300_v21  ;;  %v912_v19 = vcombine.high %v4071_v16, %v4071_v16 }
  0x99   :  { %4047 = vmatmul.mubr.msk.bf16.vlgmr.msra.gmra.mrb[4].mxu0 %vm151_vm2, %v4043_v11  ;;  %v302_v23 = vpop.permute.xlu1 %301  ;;  %v322_v27 = vsel %vm155_vm1, %v312_v25, 0 }
  0x9a   :  { %257 = vmatpush1.bf16.msra.mxu0 %v169_v22  ;;  %288 = vmatprep.mubr.bf16.mxu0 %v4430_v3  ;;  %v313_v24 = vsel %vm311_vm3, %v300_v21, %v302_v23 }
  0x9b   :  { %4050 = vmatprep.subr.msk.bf16.mxu0 %vm155_vm1, %v313_v24  ;;  %v304_v28 = vpop.permute.xlu0 %303 }
  0x9c   :  { %v314_v32 = vsel %vm311_vm3, %v302_v23, %v304_v28 }
  0x9d   :  { %v306_v26 = vpop.permute.xlu1 %305  ;;  %v328_v36 = vsel %vm155_vm1, %v314_v32, 0 }
  0x9e   :  { %v315_v29 = vsel %vm311_vm3, %v304_v28, %v306_v26 }
  0x9f   :  { %v308_v30 = vpop.permute.xlu0 %307 }
  0xa0   :  { %v316_v39 = vsel %vm311_vm3, %v306_v26, %v308_v30 }
  0xa1   :  { %4049 = vmatmul.mubr.msk.bf16.vlgmr.msra.gmra.mrb[8].mxu0 %vm151_vm2, %v4043_v11  ;;  %v310_v31 = vpop.permute.xlu1 %309  ;;  %v334_v44 = vsel %vm155_vm1, %v316_v39, 0 }
  0xa2   :  { %340 = vmatpush1.bf16.msra.mxu0 %v322_v27  ;;  %371 = vmatprep.mubr.bf16.mxu0 %v4430_v3  ;;  %v317_v35 = vsel %vm311_vm3, %v308_v30, %v310_v31 }
  0xa3   :  { %4052 = vmatprep.subr.msk.bf16.mxu0 %vm155_vm1, %v315_v29  ;;  %v502_v34 = vpop.permute.xlu0 %501  ;;  %v4078_v29 = vld [vmem:[%s5225_s1 + $0xa] sm:$0x3] }
  0xa5   :  { %v504_v38 = vpop.permute.xlu1 %503 }
  0xa6   :  { %v516_v46 = vsel %vm515_vm4, %v502_v34, %v504_v38 }
  0xa7   :  { %v506_v37 = vpop.permute.xlu0 %505  ;;  %v526_v48 = vsel %vm155_vm1, %v516_v46, 0 }
  0xa8   :  { %v517_v41 = vsel %vm515_vm4, %v504_v38, %v506_v37 }
  0xa9   :  { %4051 = vmatmul.mubr.msk.bf16.vlgmr.msra.gmra.mrb[0].mxu0 %vm151_vm2, %v92_v33  ;;  %v508_v49 = vpop.permute.xlu1 %507 }
  0xaa   :  { %381 = vmatpush1.bf16.msra.mxu0 %v328_v36  ;;  %412 = vmatprep.mubr.bf16.mxu0 %v4430_v3  ;;  %v518_v53 = vsel %vm515_vm4, %v506_v37, %v508_v49 }
  0xab   :  { %4054 = vmatprep.subr.msk.bf16.mxu0 %vm155_vm1, %v317_v35  ;;  %v510_v47 = vpop.permute.xlu0 %509  ;;  %v532_v57 = vsel %vm155_vm1, %v518_v53, 0 }
  0xac   :  { %v519_v50 = vsel %vm515_vm4, %v508_v49, %v510_v47 }
  0xad   :  { %v512_v51 = vpop.permute.xlu1 %511 }
  0xae   :  { %v520_v60 = vsel %vm515_vm4, %v510_v47, %v512_v51 }
  0xaf   :  { %v514_v52 = vpop.permute.xlu0 %513  ;;  %v538_v62 = vsel %vm155_vm1, %v520_v60, 0 }
  0xb0   :  { %v521_v56 = vsel %vm515_vm4, %v512_v51, %v514_v52 }
  0xb1   :  { %4053 = vmatmul.mubr.msk.bf16.vlgmr.msra.gmra.mrb[4].mxu0 %vm151_vm2, %v92_v33  ;;  %v712_v55 = vpop.permute.xlu1 %711 }
  0xb2   :  { %422 = vmatpush1.bf16.msra.mxu0 %v334_v44  ;;  %453 = vmatprep.mubr.bf16.mxu0 %v4430_v3 }
  0xb3   :  { %4057 = vmatprep.subr.msk.bf16.mxu0 %vm155_vm1, %v517_v41  ;;  %v714_v58 = vpop.permute.xlu0 %713 }
  0xb4   :  { %v726_v63 = vsel %vm725_vm5, %v712_v55, %v714_v58 }
  0xb5   :  { %v716_v59 = vpop.permute.xlu1 %715  ;;  %v736_v1 = vsel %vm155_vm1, %v726_v63, 0 }
  0xb6   :  { %v727_v61 = vsel %vm725_vm5, %v714_v58, %v716_v59 }
  0xb7   :  { %v718_v2 = vpop.permute.xlu0 %717 }
  0xb8   :  { %v728_v6 = vsel %vm725_vm5, %v716_v59, %v718_v2 }
  0xb9   :  { %4055 = vmatmul.mubr.msk.bf16.vlgmr.msra.gmra.mrb[8].mxu0 %vm151_vm2, %v92_v33  ;;  %v720_v0 = vpop.permute.xlu1 %719  ;;  %v742_v11 = vsel %vm155_vm1, %v728_v6, 0 }
  0xba   :  { %544 = vmatpush1.bf16.msra.mxu0 %v526_v48  ;;  %575 = vmatprep.mubr.bf16.mxu0 %v4430_v3  ;;  %v729_v4 = vsel %vm725_vm5, %v718_v2, %v720_v0 }
  0xbb   :  { %4059 = vmatprep.subr.msk.bf16.mxu0 %vm155_vm1, %v519_v50  ;;  %v722_v8 = vpop.permute.xlu0 %721  ;;  %v4085_v50 = vld [vmem:[%s5225_s1 + $0xc] sm:$0x3] }
  0xbc   :  { %v730_v12 = vsel %vm725_vm5, %v720_v0, %v722_v8 }
  0xbd   :  { %v724_v5 = vpop.permute.xlu1 %723  ;;  %v748_v13 = vsel %vm155_vm1, %v730_v12, 0 }
  0xbe   :  { %v731_v10 = vsel %vm725_vm5, %v722_v8, %v724_v5 }
  0xc1   :  { %4058 = vmatmul.mubr.msk.bf16.vlgmr.msra.gmra.mrb[0].mxu0 %vm151_vm2, %v4056_v54 }
  0xc2   :  { %585 = vmatpush1.bf16.msra.mxu0 %v532_v57  ;;  %616 = vmatprep.mubr.bf16.mxu0 %v4430_v3 }
  0xc3   :  { %4061 = vmatprep.subr.msk.bf16.mxu0 %vm155_vm1, %v521_v56 }
  0xc9   :  { %4060 = vmatmul.mubr.msk.bf16.vlgmr.msra.gmra.mrb[4].mxu0 %vm151_vm2, %v4056_v54 }
  0xca   :  { %626 = vmatpush1.bf16.msra.mxu0 %v538_v62  ;;  %657 = vmatprep.mubr.bf16.mxu0 %v4430_v3 }
  0xcb   :  { %4064 = vmatprep.subr.msk.bf16.mxu0 %vm155_vm1, %v727_v61 }
  0xd1   :  { %4062 = vmatmul.mubr.msk.bf16.vlgmr.msra.gmra.mrb[8].mxu0 %vm151_vm2, %v4056_v54 }
  0xd2   :  { %754 = vmatpush1.bf16.msra.mxu0 %v736_v1  ;;  %785 = vmatprep.mubr.bf16.mxu0 %v4430_v3 }
  0xd3   :  { %4066 = vmatprep.subr.msk.bf16.mxu0 %vm155_vm1, %v729_v4  ;;  %v4092_v4 = vld [vmem:[%s5225_s1 + $0xe] sm:$0x3] }
  0xd9   :  { %4065 = vmatmul.mubr.msk.bf16.vlgmr.msra.gmra.mrb[0].mxu0 %vm151_vm2, %v4063_v7 }
  0xda   :  { %795 = vmatpush1.bf16.msra.mxu0 %v742_v11  ;;  %826 = vmatprep.mubr.bf16.mxu0 %v4430_v3 }
  0xdb   :  { %4068 = vmatprep.subr.msk.bf16.mxu0 %vm155_vm1, %v731_v10 }
  0xe1   :  { %4067 = vmatmul.mubr.msk.bf16.vlgmr.msra.gmra.mrb[4].mxu0 %vm151_vm2, %v4063_v7 }
  0xe2   :  { %836 = vmatpush1.bf16.msra.mxu0 %v748_v13  ;;  %867 = vmatprep.mubr.bf16.mxu0 %v4430_v3 }
  0xe3   :  { %4072 = vmatprep.subr.msk.bf16.mxu0 %vm155_vm1, %v4549_v42  ;;  %v1103_v42 = vpop.permute.xlu0 %1102 }
  0xe7   :  { %v1107_v40 = vpop.permute.xlu0 %1106 }
  0xe9   :  { %4069 = vmatmul.mubr.msk.bf16.vlgmr.msra.gmra.mrb[8].mxu0 %vm151_vm2, %v4063_v7 }
  0xea   :  { %935 = vmatpush1.bf16.msra.mxu0 %v917_v14  ;;  %966 = vmatprep.mubr.bf16.mxu0 %v4430_v3 }
  0xeb   :  { %4074 = vmatprep.subr.msk.bf16.mxu0 %vm155_vm1, %v4560_v45  ;;  %v1105_v45 = vpop.permute.xlu1 %1104  ;;  %v1111_v22 = vpop.permute.xlu0 %1110 }
  0xec   :  { %v1118_v21 = vsel %vm1116_vm6, %v1105_v45, %v1107_v40  ;;  %v1117_v43 = vsel %vm1116_vm6, %v1103_v42, %v1105_v45  ;;  %v4099_v45 = vld [vmem:[%s5225_s1 + $0x10] sm:$0x3] }
  0xed   :  { %v1127_v23 = vsel %vm155_vm1, %v1117_v43, 0 }
  0xef   :  { %v1109_v24 = vpop.permute.xlu1 %1108  ;;  %v1115_v27 = vpop.permute.xlu0 %1114 }
  0xf0   :  { %v1120_v25 = vsel %vm1116_vm6, %v1109_v24, %v1111_v22  ;;  %v1119_v28 = vsel %vm1116_vm6, %v1107_v40, %v1109_v24  ;;  %v1906_v24 = vsub.s32 0, %v4499_v9 }
  0xf1   :  { %4073 = vmatmul.mubr.msk.bf16.vlgmr.msra.gmra.mrb[0].mxu0 %vm151_vm2, %v4070_v17  ;;  %v1133_v32 = vsel %vm155_vm1, %v1119_v28, 0 }
  0xf2   :  { %976 = vmatpush1.bf16.msra.mxu0 %v923_v18  ;;  %1007 = vmatprep.mubr.bf16.mxu0 %v4430_v3 }
  0xf3   :  { %4076 = vmatprep.subr.msk.bf16.mxu0 %vm155_vm1, %v912_v19  ;;  %v1113_v26 = vpop.permute.xlu1 %1112  ;;  %v1315_v33 = vpop.permute.xlu0 %1314 }
  0xf4   :  { %v1122_v31 = vsel %vm1116_vm6, %v1113_v26, %v1115_v27  ;;  %v1121_v35 = vsel %vm1116_vm6, %v1111_v22, %v1113_v26  ;;  %v1910_v26 = vsub.s32 1, %v4499_v9 }
  0xf5   :  { %v1139_v37 = vsel %vm155_vm1, %v1121_v35, 0  ;;  %v1918_v35 = vsub.s32 3, %v4499_v9 }
  0xf7   :  { %v1313_v30 = vpop.permute.xlu1 %1312  ;;  %v1319_v44 = vpop.permute.xlu0 %1318 }
  0xf8   :  { %v1327_v38 = vsel %vm1326_vm7, %v1313_v30, %v1315_v33 }
  0xf9   :  { %4075 = vmatmul.mubr.msk.bf16.vlgmr.msra.gmra.mrb[4].mxu0 %vm151_vm2, %v4070_v17  ;;  %v1337_v41 = vsel %vm155_vm1, %v1327_v38, 0 }
  0xfa   :  { %1017 = vmatpush1.bf16.msra.mxu0 %v929_v20  ;;  %1048 = vmatprep.mubr.bf16.mxu0 %v4430_v3 }
  0xfb   :  { %4079 = vmatprep.subr.msk.bf16.mxu0 %vm155_vm1, %v1118_v21  ;;  %v1317_v34 = vpop.permute.xlu1 %1316  ;;  %v1323_v47 = vpop.permute.xlu0 %1322 }
  0xfc   :  { %v1328_v36 = vsel %vm1326_vm7, %v1315_v33, %v1317_v34  ;;  %v1329_v49 = vsel %vm1326_vm7, %v1317_v34, %v1319_v44 }
  0xfd   :  { %v1343_v53 = vsel %vm155_vm1, %v1329_v49, 0 }
  0xff   :  { %v1321_v39 = vpop.permute.xlu1 %1320  ;;  %v1523_v51 = vpop.permute.xlu0 %1522 }
 0x100   :  { %v1330_v46 = vsel %vm1326_vm7, %v1319_v44, %v1321_v39  ;;  %v1331_v56 = vsel %vm1326_vm7, %v1321_v39, %v1323_v47 }
 0x101   :  { %4077 = vmatmul.mubr.msk.bf16.vlgmr.msra.gmra.mrb[8].mxu0 %vm151_vm2, %v4070_v17  ;;  %v1349_v58 = vsel %vm155_vm1, %v1331_v56, 0 }
 0x102   :  { %1145 = vmatpush1.bf16.msra.mxu0 %v1127_v23  ;;  %1176 = vmatprep.mubr.bf16.mxu0 %v4430_v3 }
 0x103   :  { %4081 = vmatprep.subr.msk.bf16.mxu0 %vm155_vm1, %v1120_v25  ;;  %v1325_v48 = vpop.permute.xlu1 %1324  ;;  %v1527_v54 = vpop.permute.xlu0 %1526  ;;  %v33_v25 = vld [vmem:[%s5229_s5] sm:$0x3f] }
 0x104   :  { %v1332_v52 = vsel %vm1326_vm7, %v1323_v47, %v1325_v48  ;;  %v4801_v27 = vrot.slane %v33_v25, %v1906_v24  ;;  %v4803_v28 = vrot.slane %v33_v25, %v1910_v26  ;;  %v4823_v49 = vrot.slane %v33_v25, %v1918_v35 }
 0x107   :  { %v1525_v55 = vpop.permute.xlu1 %1524  ;;  %v1531_v60 = vpop.permute.xlu0 %1530 }
 0x108   :  { %v1538_v57 = vsel %vm1536_vm8, %v1525_v55, %v1527_v54  ;;  %v1537_v59 = vsel %vm1536_vm8, %v1523_v51, %v1525_v55 }
 0x109   :  { %4080 = vmatmul.mubr.msk.bf16.vlgmr.msra.gmra.mrb[0].mxu0 %vm151_vm2, %v4078_v29  ;;  %v1547_v61 = vsel %vm155_vm1, %v1537_v59, 0 }
 0x10a   :  { %1186 = vmatpush1.bf16.msra.mxu0 %v1133_v32  ;;  %1217 = vmatprep.mubr.bf16.mxu0 %v4430_v3  ;;  %v1914_v32 = vsub.s32 2, %v4499_v9 }
 0x10b   :  { %4083 = vmatprep.subr.msk.bf16.mxu0 %vm155_vm1, %v1122_v31  ;;  %v1529_v62 = vpop.permute.xlu1 %1528  ;;  %v1535_v1 = vpop.permute.xlu0 %1534 }
 0x10c   :  { %v1540_v63 = vsel %vm1536_vm8, %v1529_v62, %v1531_v60  ;;  %v1539_v2 = vsel %vm1536_vm8, %v1527_v54, %v1529_v62  ;;  %v4820_v47 = vrot.slane %v33_v25, %v1914_v32  ;;  %v1922_v54 = vsub.s32 4, %v4499_v9 }
 0x10d   :  { %v1553_v7 = vsel %vm155_vm1, %v1539_v2, 0 }
 0x10f   :  { %v1533_v0 = vpop.permute.xlu1 %1532  ;;  %v1735_v8 = vpop.permute.xlu0 %1734 }
 0x110   :  { %v1542_v6 = vsel %vm1536_vm8, %v1533_v0, %v1535_v1  ;;  %v1541_v11 = vsel %vm1536_vm8, %v1531_v60, %v1533_v0  ;;  %v4832_v1 = vrot.slane %v33_v25, %v1922_v54 }
 0x111   :  { %4082 = vmatmul.mubr.msk.bf16.vlgmr.msra.gmra.mrb[4].mxu0 %vm151_vm2, %v4078_v29  ;;  %v1559_v13 = vsel %vm155_vm1, %v1541_v11, 0 }
 0x112   :  { %1227 = vmatpush1.bf16.msra.mxu0 %v1139_v37  ;;  %1258 = vmatprep.mubr.bf16.mxu0 %v4430_v3 }
 0x113   :  { %4086 = vmatprep.subr.msk.bf16.mxu0 %vm155_vm1, %v1328_v36  ;;  %v1733_v5 = vpop.permute.xlu1 %1732  ;;  %v1739_v18 = vpop.permute.xlu0 %1738 }
 0x114   :  { %v1747_v14 = vsel %vm1746_vm9, %v1733_v5, %v1735_v8 }
 0x115   :  { %v1757_v17 = vsel %vm155_vm1, %v1747_v14, 0 }
 0x117   :  { %v1737_v10 = vpop.permute.xlu1 %1736  ;;  %v1743_v20 = vpop.permute.xlu0 %1742 }
 0x118   :  { %v1748_v12 = vsel %vm1746_vm9, %v1735_v8, %v1737_v10  ;;  %v1749_v40 = vsel %vm1746_vm9, %v1737_v10, %v1739_v18 }
 0x119   :  { %4084 = vmatmul.mubr.msk.bf16.vlgmr.msra.gmra.mrb[8].mxu0 %vm151_vm2, %v4078_v29  ;;  %v1763_v43 = vsel %vm155_vm1, %v1749_v40, 0 }
 0x11a   :  { %1355 = vmatpush1.bf16.msra.mxu0 %v1337_v41  ;;  %1386 = vmatprep.mubr.bf16.mxu0 %v4430_v3 }
 0x11b   :  { %4088 = vmatprep.subr.msk.bf16.mxu0 %vm155_vm1, %v1330_v46  ;;  %v1741_v16 = vpop.permute.xlu1 %1740 }
 0x11c   :  { %v1750_v42 = vsel %vm1746_vm9, %v1739_v18, %v1741_v16  ;;  %v1751_v22 = vsel %vm1746_vm9, %v1741_v16, %v1743_v20 }
 0x11d   :  { %v1769_v23 = vsel %vm155_vm1, %v1751_v22, 0  ;;  %v1978_v22 = vld [vmem:[%s5227_s3] sm:$0xf] }
 0x11f   :  { %v1745_v19 = vpop.permute.xlu1 %1744 }
 0x120   :  { %v1752_v21 = vsel %vm1746_vm9, %v1743_v20, %v1745_v19 }
 0x121   :  { %4087 = vmatmul.mubr.msk.bf16.vlgmr.msra.gmra.mrb[0].mxu0 %vm151_vm2, %v4085_v50 }
 0x122   :  { %1396 = vmatpush1.bf16.msra.mxu0 %v1343_v53  ;;  %1427 = vmatprep.mubr.bf16.mxu0 %v4430_v3 }
 0x123   :  { %4090 = vmatprep.subr.msk.bf16.mxu0 %vm155_vm1, %v1332_v52 }
 0x129   :  { %4089 = vmatmul.mubr.msk.bf16.vlgmr.msra.gmra.mrb[4].mxu0 %vm151_vm2, %v4085_v50 }
 0x12a   :  { %1437 = vmatpush1.bf16.msra.mxu0 %v1349_v58  ;;  %1468 = vmatprep.mubr.bf16.mxu0 %v4430_v3 }
 0x12b   :  { %4093 = vmatprep.subr.msk.bf16.mxu0 %vm155_vm1, %v1538_v57  ;;  %v1926_v57 = vsub.s32 5, %v4499_v9 }
 0x12d   :  { %v4835_v5 = vrot.slane %v33_v25, %v1926_v57 }
 0x131   :  { %4091 = vmatmul.mubr.msk.bf16.vlgmr.msra.gmra.mrb[8].mxu0 %vm151_vm2, %v4085_v50 }
 0x132   :  { %1565 = vmatpush1.bf16.msra.mxu0 %v1547_v61  ;;  %1596 = vmatprep.mubr.bf16.mxu0 %v4430_v3 }
 0x133   :  { %4095 = vmatprep.subr.msk.bf16.mxu0 %vm155_vm1, %v1540_v63 }
 0x139   :  { %4094 = vmatmul.mubr.msk.bf16.vlgmr.msra.gmra.mrb[0].mxu0 %vm151_vm2, %v4092_v4 }
 0x13a   :  { %1606 = vmatpush1.bf16.msra.mxu0 %v1553_v7  ;;  %1637 = vmatprep.mubr.bf16.mxu0 %v4430_v3 }
 0x13b   :  { %4097 = vmatprep.subr.msk.bf16.mxu0 %vm155_vm1, %v1542_v6 }
 0x141   :  { %4096 = vmatmul.mubr.msk.bf16.vlgmr.msra.gmra.mrb[4].mxu0 %vm151_vm2, %v4092_v4 }
 0x142   :  { %1647 = vmatpush1.bf16.msra.mxu0 %v1559_v13  ;;  %1678 = vmatprep.mubr.bf16.mxu0 %v4430_v3 }
 0x143   :  { %4100 = vmatprep.subr.msk.bf16.mxu0 %vm155_vm1, %v1748_v12 }
 0x149   :  { %4098 = vmatmul.mubr.msk.bf16.vlgmr.msra.gmra.mrb[8].mxu0 %vm151_vm2, %v4092_v4 }
 0x14a   :  { %1775 = vmatpush1.bf16.msra.mxu0 %v1757_v17  ;;  %1806 = vmatprep.mubr.bf16.mxu0 %v4430_v3 }
 0x14b   :  { %4102 = vmatprep.subr.msk.bf16.mxu0 %vm155_vm1, %v1750_v42 }
 0x151   :  { %4101 = vmatmul.mubr.msk.bf16.vlgmr.msra.gmra.mrb[0].mxu0 %vm151_vm2, %v4099_v45 }
 0x152   :  { %1816 = vmatpush1.bf16.msra.mxu0 %v1763_v43  ;;  %1847 = vmatprep.mubr.bf16.mxu0 %v4430_v3  ;;  %v2004_v43 = vld [vmem:[%s5228_s4] sm:$0xf] }
 0x153   :  { %4104 = vmatprep.subr.msk.bf16.mxu0 %vm155_vm1, %v1752_v21 }
 0x159   :  { %4103 = vmatmul.mubr.msk.bf16.vlgmr.msra.gmra.mrb[4].mxu0 %vm151_vm2, %v4099_v45 }
 0x15a   :  { %1857 = vmatpush1.bf16.msra.mxu0 %v1769_v23  ;;  %1888 = vmatprep.mubr.bf16.mxu0 %v4430_v3 }
 0x161   :  { %4105 = vmatmul.mubr.msk.bf16.vlgmr.msra.gmra.mrb[8].mxu0 %vm151_vm2, %v4099_v45 }
 0x224   :  { %v4805_v29 = vpop.f32.mrb[0].mxu0 }
 0x225   :  { %v1934_v30 = vmul.f32 %v4801_v27, %v4805_v29  ;;  %v4809_v31 = vpop.f32.mrb[1].mxu0 }
 0x226   :  { %v1935_v33 = vmul.f32 %v4803_v28, %v4809_v31  ;;  %v1812_v34 = vpop.f32.mrb[2].mxu0 }
 0x227   :  { %v1941_v36 = vsel %vm5233_vm10, %v1934_v30, 0.0  ;;  %v1954_v37 = vmul.f32 %v1934_v30, %v4805_v29  ;;  %v1813_v38 = vpop.f32.mrb[3].mxu0 }
 0x228   :  { %v1942_v39 = vsel %vm5233_vm10, %v1935_v33, 0.0  ;;  %v1955_v41 = vmul.f32 %v1935_v33, %v4809_v31 }
 0x229   :  { %v1960_v44 = vsel %vm5233_vm10, %v1954_v37, 0.0  ;;  %v1943_v46 = vadd.f32 %v1942_v39, %v1941_v36 }
 0x22a   :  { %v1961_v48 = vsel %vm5233_vm10, %v1955_v41, 0.0 }
 0x22b   :  { %v1962_v50 = vadd.f32 %v1961_v48, %v1960_v44 }
 0x22c   :  { %v1849_v51 = vpop.f32.mrb[4].mxu0 }
 0x22d   :  { %v1936_v52 = vmul.f32 %v4820_v47, %v1849_v51  ;;  %v1851_v53 = vpop.f32.mrb[5].mxu0 }
 0x22e   :  { %v1937_v55 = vmul.f32 %v4823_v49, %v1851_v53  ;;  %v1853_v56 = vpop.f32.mrb[6].mxu0 }
 0x22f   :  { %v1944_v58 = vsel %vm5233_vm10, %v1936_v52, 0.0  ;;  %v1956_v59 = vmul.f32 %v1936_v52, %v1849_v51  ;;  %v1854_v60 = vpop.f32.mrb[7].mxu0 }
 0x230   :  { %v1945_v61 = vadd.f32 %v1944_v58, %v1943_v46  ;;  %v1946_v62 = vsel %vm5233_vm10, %v1937_v55, 0.0  ;;  %v1957_v63 = vmul.f32 %v1937_v55, %v1851_v53 }
 0x231   :  { %v1963_v0 = vsel %vm5233_vm10, %v1956_v59, 0.0 }
 0x232   :  { %v1964_v2 = vadd.f32 %v1963_v0, %v1962_v50  ;;  %v1965_v4 = vsel %vm5233_vm10, %v1957_v63, 0.0  ;;  %v1947_v6 = vadd.f32 %v1946_v62, %v1945_v61 }
 0x234   :  { %v1890_v7 = vpop.f32.mrb[8].mxu0  ;;  %v1966_v9 = vadd.f32 %v1965_v4, %v1964_v2 }
 0x235   :  { %v1938_v8 = vmul.f32 %v4832_v1, %v1890_v7  ;;  %v1892_v10 = vpop.f32.mrb[9].mxu0 }
 0x236   :  { %v1939_v11 = vmul.f32 %v4835_v5, %v1892_v10  ;;  %v1894_v12 = vpop.f32.mrb[10].mxu0 }
 0x237   :  { %v1958_v13 = vmul.f32 %v1938_v8, %v1890_v7  ;;  %v1895_v14 = vpop.f32.mrb[11].mxu0  ;;  %v1948_v16 = vsel %vm5233_vm10, %v1938_v8, 0.0 }
 0x238   :  { %v1959_v17 = vmul.f32 %v1939_v11, %v1892_v10  ;;  %v1949_v18 = vadd.f32 %v1948_v16, %v1947_v6  ;;  %v1950_v42 = vsel %vm5233_vm10, %v1939_v11, 0.0 }
 0x239   :  { %v1967_v19 = vsel %vm5233_vm10, %v1958_v13, 0.0 }
 0x23a   :  { %v1951_v40 = vadd.f32 %v1950_v42, %v1949_v18  ;;  %v1968_v45 = vadd.f32 %v1967_v19, %v1966_v9  ;;  %v1969_v20 = vsel %vm5233_vm10, %v1959_v17, 0.0 }
 0x23c   :  { %1952 = vadd.xlane.f32.xlu0 %v1951_v40  ;;  %v1970_v21 = vadd.f32 %v1969_v20, %v1968_v45 }
 0x23e   :  { %1971 = vadd.xlane.f32.xlu1 %v1970_v21 }
 0x24f   :  { %2007 = vperm.xlu1 %4377, %v2004_v43  }
 0x252   :  { %1987 = vperm.xlu0 %4376, %v1978_v22  }
 0x2c9   :  { %v1953_v23 = vpop.xlane.xlu0 %1952 }
 0x2ca   :  { %v1973_v24 = vmul.f32 0.001953125, %v1953_v23 }
 0x2cb   :  { %v1972_v25 = vpop.xlane.xlu1 %1971 }
 0x2cc   :  { %v1974_v26 = vmul.f32 0.001953125, %v1972_v25  ;;  %v1975_v30 = vmul.f32 %v1973_v24, %v1973_v24  ;;  %v1979_v36 = vsub.f32 %v4805_v29, %v1973_v24  ;;  %v1980_v37 = vsub.f32 %v4809_v31, %v1973_v24 }
 0x2cd   :  { %v1981_v38 = vsub.f32 %v1849_v51, %v1973_v24  ;;  %v1982_v39 = vsub.f32 %v1851_v53, %v1973_v24  ;;  %v1983_v41 = vsub.f32 %v1890_v7, %v1973_v24  ;;  %v1984_v44 = vsub.f32 %v1892_v10, %v1973_v24 }
 0x2ce   :  { %v1976_v32 = vsub.f32 %v1974_v26, %v1975_v30  ;;  %v4854_v29 = vstv %s5230_s6 }
 0x2cf   :  { %v2008_v57 = vpop.permute.xlu1 %2007 }
 0x2d0   :  { %v1977_v33 = vmax.f32 %v1976_v32, 0.0 }
 0x2d1   :  { %v1988_v35 = vpop.permute.xlu0 %1987 }
 0x2d2   :  { %v1996_v34 = vadd.f32 1e-05, %v1977_v33  ;;  %v1990_v46 = vmul.f32 %v1988_v35, %v1979_v36  ;;  %v1991_v48 = vmul.f32 %v1988_v35, %v1980_v37  ;;  %v1992_v50 = vmul.f32 %v1988_v35, %v1981_v38 }
 0x2d3   :  { %v1993_v52 = vmul.f32 %v1988_v35, %v1982_v39  ;;  %v1994_v55 = vmul.f32 %v1988_v35, %v1983_v41  ;;  %v1995_v56 = vmul.f32 %v1988_v35, %v1984_v44 }
 0x2d4   :  { %4400 = vrsqrt.f32 %v1996_v34 }
 0x2de   :  { %v4401_v54 = vpop.eup %4400 }
 0x2df   :  { %v1998_v58 = vmul.f32 %v4401_v54, %v1990_v46  ;;  %v1999_v59 = vmul.f32 %v4401_v54, %v1991_v48  ;;  %v2000_v60 = vmul.f32 %v4401_v54, %v1992_v50  ;;  %v2001_v61 = vmul.f32 %v4401_v54, %v1993_v52 }
 0x2e0   :  { %v2002_v31 = vmul.f32 %v4401_v54, %v1994_v55  ;;  %v2003_v51 = vmul.f32 %v4401_v54, %v1995_v56 }
 0x2e1   :  { %v2010_v53 = vadd.f32 %v2008_v57, %v1998_v58  ;;  %v2011_v62 = vadd.f32 %v2008_v57, %v1999_v59  ;;  %v2012_v63 = vadd.f32 %v2008_v57, %v2000_v60  ;;  %v2013_v0 = vadd.f32 %v2008_v57, %v2001_v61 }
 0x2e2   :  { %v2014_v2 = vadd.f32 %v2008_v57, %v2002_v31  ;;  %v2015_v4 = vadd.f32 %v2008_v57, %v2003_v51 }
 0x2e3   :  { %vm2016_vm11 = vcmp.gt.f32.partialorder %v2010_v53, 0.0  ;;  %vm2017_vm12 = vcmp.gt.f32.partialorder %v2011_v62, 0.0  ;;  %vm2018_vm13 = vcmp.gt.f32.partialorder %v2012_v63, 0.0  ;;  %vm2019_vm14 = vcmp.gt.f32.partialorder %v2013_v0, 0.0 }
 0x2e4   :  { %vm2020_vm15 = vcmp.gt.f32.partialorder %v2014_v2, 0.0  ;;  %vm2021_vm10 = vcmp.gt.f32.partialorder %v2015_v4, 0.0  ;;  %v2023_v6 = vmul.f32 %v4854_v29, %v2010_v53  ;;  %v2024_v7 = vmul.f32 %v4854_v29, %v2011_v62 }
 0x2e5   :  { %v2025_v9 = vmul.f32 %v4854_v29, %v2012_v63  ;;  %v2026_v8 = vmul.f32 %v4854_v29, %v2013_v0  ;;  %v2027_v10 = vmul.f32 %v4854_v29, %v2014_v2  ;;  %v2028_v11 = vmul.f32 %v4854_v29, %v2015_v4 }
 0x2e6   :  { %v2029_v12 = vsel %vm2016_vm11, %v2010_v53, %v2023_v6  ;;  %v2030_v13 = vsel %vm2017_vm12, %v2011_v62, %v2024_v7 }
 0x2e7   :  { %v2031_v14 = vsel %vm2018_vm13, %v2012_v63, %v2025_v9  ;;  %v2032_v16 = vsel %vm2019_vm14, %v2013_v0, %v2026_v8  ;;  %v2033_v17 = vsel %vm2020_vm15, %v2014_v2, %v2027_v10  ;;  %v2034_v18 = vsel %vm2021_vm10, %v2015_v4, %v2028_v11 }
 0x2e8   :  { %v2035_v42 = vmul.f32 %v2029_v12, %v4801_v27  ;;  %v2036_v19 = vmul.f32 %v2030_v13, %v4803_v28  ;;  %v2037_v40 = vmul.f32 %v2031_v14, %v4820_v47  ;;  %v2038_v45 = vmul.f32 %v2032_v16, %v4823_v49 }
 0x2e9   :  { %v2039_v20 = vmul.f32 %v2033_v17, %v4832_v1  ;;  %v2040_v21 = vmul.f32 %v2034_v18, %v4835_v5 }
 0x2ea   :  { %v4106_v43 = vpack.c.bf16 %v2036_v19, %v2035_v42  ;;  %v4107_v22 = vpack.c.bf16 %v2038_v45, %v2037_v40 }
 0x2eb   :  { %v4108_v23 = vpack.c.bf16 %v2040_v21, %v2039_v20 }
 0x2ec   :  { %v2061_v24 = vrot.slane %v4106_v43, %v4504_v15  ;;  %v2068_v25 = vrot.slane %v4107_v22, %v4504_v15 }
 0x2ed   :  { %4109 = vst.sshfl [vmem:[#allocation2 + $0xa] sm:$0x33 pattern:$0x76325410] %v4108_v23 }
 0x2ee   :  { %v2069_v26 = vcombine.low %v2061_v24, %v2068_v25  ;;  %v4405_v58 = vcombine.low %v2068_v25, %v2068_v25  ;;  %v4110_v24 = vld [vmem:[%s5226_s2 + $0x2] sm:$0x3] }
 0x2f0   :  { %2080 = vst [vmem:[#allocation2 + $0x2] sm:$0xff] %v2069_v26  ;;  %v4901_v57 = vrot.slane %v2069_v26, %v4504_v15  ;;  %v4907_v60 = vrot.slane %v4405_v58, %v4504_v15  ;;  %v2084_v58 = vld [vmem:[%s5226_s2] sm:$0x3] }
 0x2f2   :  { %v4920_v63 = vcombine.high %v4901_v57, %v4901_v57  ;;  %v4928_v4 = vcombine.high %v4907_v60, %v4907_v60 }
 0x2f4   :  { %v3050_v61 = vld [vmem:[#allocation2 + $0xa] sm:$0x3f] }
 0x2f5   :  { %v3079_v31 = vrot.slane %v3050_v61, %v4504_v15  ;;  %v3072_v51 = vcombine.high %v3050_v61, %v3050_v61  ;;  %v3259_v0 = vld [vmem:[#allocation2 + $0xa] sm:$0x3f] }
 0x2f6   :  { %v3288_v6 = vrot.slane %v3259_v0, %v4504_v15  ;;  %v3468_v8 = vld [vmem:[#allocation2 + $0xa] sm:$0x3f]  ;;  %v3281_v13 = vcombine.high %v3259_v0, %v3259_v0 }
 0x2f7   :  { %v2082_v30 = vld [vmem:[#allocation2] sm:$0xff]  ;;  %v2083_v32 = vld [vmem:[#allocation2 + $0x8] sm:$0x3f]  ;;  %v3086_v53 = vrot.slane %v3072_v51, %v4504_v15  ;;  %v3087_v9 = vcombine.high %v3079_v31, %v3079_v31  ;;  %v3497_v10 = vrot.slane %v3468_v8, %v4504_v15  ;;  %v3490_v11 = vcombine.high %v3468_v8, %v3468_v8 }
 0x2f8   :  { %v2096_v33 = vrot.slane %v2082_v30, %v4504_v15  ;;  %v2106_v34 = vcombine.high %v2083_v32, %v2083_v32  ;;  %v2089_v36 = vcombine.high %v2082_v30, %v2082_v30  ;;  %v2113_v39 = vrot.slane %v2083_v32, %v4504_v15  ;;  %v2451_v46 = vld [vmem:[#allocation2 + $0x8] sm:$0x3f] }
 0x2f9   :  { %v2480_v48 = vrot.slane %v2451_v46, %v4504_v15  ;;  %v2473_v50 = vcombine.high %v2451_v46, %v2451_v46  ;;  %v2660_v54 = vld [vmem:[#allocation2 + $0x8] sm:$0x3f]  ;;  %v3296_v7 = vcombine.high %v3288_v6, %v3288_v6  ;;  %v3504_v12 = vrot.slane %v3490_v11, %v4504_v15 }
 0x2fa   :  { %2122 = vrot.lane.b32.xlu1 %v2096_v33, %s4432_s11  ;;  %v2120_v35 = vrot.slane %v2106_v34, %v4504_v15  ;;  %v2104_v37 = vcombine.high %v2096_v33, %v2096_v33  ;;  %v2103_v38 = vrot.slane %v2089_v36, %v4504_v15  ;;  %v2121_v44 = vcombine.high %v2113_v39, %v2113_v39  ;;  %v3677_v14 = vld [vmem:[#allocation2 + $0xa] sm:$0x3f] }
 0x2fb   :  { %v2487_v52 = vrot.slane %v2473_v50, %v4504_v15  ;;  %v2689_v55 = vrot.slane %v2660_v54, %v4504_v15  ;;  %v2488_v59 = vcombine.high %v2480_v48, %v2480_v48  ;;  %v2682_v62 = vcombine.high %v2660_v54, %v2660_v54 }
 0x2fc   :  { %2134 = vrot.lane.b32.xlu0 %v2120_v35, %s4432_s11  ;;  %v2105_v41 = vcombine.high %v2103_v38, %v2103_v38  ;;  %v3295_v16 = vrot.slane %v3281_v13, %v4504_v15  ;;  %v3706_v17 = vrot.slane %v3677_v14, %v4504_v15  ;;  %v3505_v42 = vcombine.high %v3497_v10, %v3497_v10 }
 0x2fd   :  { %v2697_v56 = vcombine.high %v2689_v55, %v2689_v55  ;;  %v2696_v2 = vrot.slane %v2682_v62, %v4504_v15  ;;  %v3699_v40 = vcombine.high %v3677_v14, %v3677_v14  ;;  %v4123_v14 = vld [vmem:[%s5226_s2 + $0x4] sm:$0x3] }
 0x2fe   :  { %2124 = vrot.lane.b32.xlu1 %v2104_v37, %s4432_s11  ;;  %v3714_v18 = vcombine.high %v3706_v17, %v3706_v17 }
 0x2ff   :  { %v3713_v20 = vrot.slane %v3699_v40, %v4504_v15 }
 0x300   :  { %2288 = vrot.lane.b32.xlu0 %v2104_v37, %s4433_s12 }
 0x302   :  { %2126 = vrot.lane.b32.xlu1 %v2103_v38, %s4432_s11 }
 0x304   :  { %2292 = vrot.lane.b32.xlu0 %v2105_v41, %s4433_s12 }
 0x306   :  { %2128 = vrot.lane.b32.xlu1 %v2105_v41, %s4432_s11 }
 0x308   :  { %2296 = vrot.lane.b32.xlu0 %v2121_v44, %s4433_s12 }
 0x30a   :  { %2130 = vrot.lane.b32.xlu1 %v2113_v39, %s4432_s11 }
 0x30c   :  { %2489 = vrot.lane.b32.xlu0 %v2096_v33, %s4434_s13 }
 0x30e   :  { %2132 = vrot.lane.b32.xlu1 %v2121_v44, %s4432_s11 }
 0x310   :  { %2493 = vrot.lane.b32.xlu0 %v2103_v38, %s4434_s13 }
 0x312   :  { %2286 = vrot.lane.b32.xlu1 %v2096_v33, %s4433_s12 }
 0x314   :  { %2497 = vrot.lane.b32.xlu0 %v2480_v48, %s4434_s13 }
 0x316   :  { %2290 = vrot.lane.b32.xlu1 %v2103_v38, %s4433_s12 }
 0x318   :  { %2501 = vrot.lane.b32.xlu0 %v2487_v52, %s4434_s13 }
 0x31a   :  { %2294 = vrot.lane.b32.xlu1 %v2113_v39, %s4433_s12 }
 0x31c   :  { %2700 = vrot.lane.b32.xlu0 %v2104_v37, %s4435_s14 }
 0x31e   :  { %2298 = vrot.lane.b32.xlu1 %v2120_v35, %s4433_s12 }
 0x320   :  { %2704 = vrot.lane.b32.xlu0 %v2105_v41, %s4435_s14 }
 0x322   :  { %2491 = vrot.lane.b32.xlu1 %v2104_v37, %s4434_s13 }
 0x324   :  { %2708 = vrot.lane.b32.xlu0 %v2697_v56, %s4435_s14 }
 0x326   :  { %2495 = vrot.lane.b32.xlu1 %v2105_v41, %s4434_s13 }
 0x328   :  { %3088 = vrot.lane.b32.xlu0 %v4901_v57, %s4436_s15 }
 0x32a   :  { %2499 = vrot.lane.b32.xlu1 %v2488_v59, %s4434_s13 }
 0x32c   :  { %3092 = vrot.lane.b32.xlu0 %v4907_v60, %s4436_s15 }
 0x32e   :  { %2698 = vrot.lane.b32.xlu1 %v2096_v33, %s4435_s14 }
 0x330   :  { %3096 = vrot.lane.b32.xlu0 %v3079_v31, %s4436_s15 }
 0x332   :  { %2702 = vrot.lane.b32.xlu1 %v2103_v38, %s4435_s14 }
 0x334   :  { %3100 = vrot.lane.b32.xlu0 %v3086_v53, %s4436_s15 }
 0x336   :  { %2706 = vrot.lane.b32.xlu1 %v2689_v55, %s4435_s14 }
 0x338   :  { %3299 = vrot.lane.b32.xlu0 %v4920_v63, %s4437_s16 }
 0x33a   :  { %2710 = vrot.lane.b32.xlu1 %v2696_v2, %s4435_s14 }
 0x33c   :  { %3303 = vrot.lane.b32.xlu0 %v4928_v4, %s4437_s16 }
 0x33e   :  { %3090 = vrot.lane.b32.xlu1 %v4920_v63, %s4436_s15 }
 0x340   :  { %3307 = vrot.lane.b32.xlu0 %v3296_v7, %s4437_s16 }
 0x342   :  { %3094 = vrot.lane.b32.xlu1 %v4928_v4, %s4436_s15 }
 0x344   :  { %3506 = vrot.lane.b32.xlu0 %v4901_v57, %s4438_s17 }
 0x346   :  { %3098 = vrot.lane.b32.xlu1 %v3087_v9, %s4436_s15 }
 0x348   :  { %3510 = vrot.lane.b32.xlu0 %v4907_v60, %s4438_s17 }
 0x34a   :  { %3297 = vrot.lane.b32.xlu1 %v4901_v57, %s4437_s16 }
 0x34c   :  { %3514 = vrot.lane.b32.xlu0 %v3497_v10, %s4438_s17 }
 0x34e   :  { %3301 = vrot.lane.b32.xlu1 %v4907_v60, %s4437_s16 }
 0x350   :  { %3518 = vrot.lane.b32.xlu0 %v3504_v12, %s4438_s17 }
 0x352   :  { %3305 = vrot.lane.b32.xlu1 %v3288_v6, %s4437_s16 }
 0x354   :  { %3717 = vrot.lane.b32.xlu0 %v4920_v63, %s4439_s18 }
 0x356   :  { %3309 = vrot.lane.b32.xlu1 %v3295_v16, %s4437_s16 }
 0x358   :  { %3721 = vrot.lane.b32.xlu0 %v4928_v4, %s4439_s18 }
 0x35a   :  { %3508 = vrot.lane.b32.xlu1 %v4920_v63, %s4438_s17 }
 0x35c   :  { %3725 = vrot.lane.b32.xlu0 %v3714_v18, %s4439_s18 }
 0x35e   :  { %3512 = vrot.lane.b32.xlu1 %v4928_v4, %s4438_s17 }
 0x362   :  { %3516 = vrot.lane.b32.xlu1 %v3505_v42, %s4438_s17 }
 0x366   :  { %3715 = vrot.lane.b32.xlu1 %v4901_v57, %s4439_s18 }
 0x36a   :  { %3719 = vrot.lane.b32.xlu1 %v4907_v60, %s4439_s18 }
 0x36c   :  { %v2123_v19 = vpop.permute.xlu1 %2122 }
 0x36e   :  { %3723 = vrot.lane.b32.xlu1 %v3706_v17, %s4439_s18  ;;  %v2135_v26 = vpop.permute.xlu0 %2134 }
 0x370   :  { %v2125_v45 = vpop.permute.xlu1 %2124 }
 0x371   :  { %v2136_v21 = vsel %vm144_vm0, %v2123_v19, %v2125_v45 }
 0x372   :  { %3727 = vrot.lane.b32.xlu1 %v3713_v20, %s4439_s18  ;;  %v2146_v23 = vsel %vm155_vm1, %v2136_v21, 0  ;;  %v2289_v37 = vpop.permute.xlu0 %2288 }
 0x374   :  { %v2127_v43 = vpop.permute.xlu1 %2126 }
 0x375   :  { %v2137_v22 = vsel %vm144_vm0, %v2125_v45, %v2127_v43 }
 0x376   :  { %4111 = vmatprep.subr.msk.bf16.mxu1 %vm155_vm1, %v2137_v22  ;;  %v2293_v44 = vpop.permute.xlu0 %2292 }
 0x377   :  { %2164 = vmatpush1.bf16.msra.mxu1 %v2146_v23 }
 0x378   :  { %v2129_v25 = vpop.permute.xlu1 %2128 }
 0x379   :  { %v2138_v15 = vsel %vm144_vm0, %v2127_v43, %v2129_v25 }
 0x37a   :  { %4112 = vmatmul.mubr.msk.bf16.vlgmr.msra.gmra.mrb[0].mxu1 %vm151_vm2, %v4110_v24  ;;  %v2152_v33 = vsel %vm155_vm1, %v2138_v15, 0  ;;  %v2297_v55 = vpop.permute.xlu0 %2296 }
 0x37b   :  { %2236 = vmatprep.mubr.bf16.mxu1 %v4430_v3 }
 0x37c   :  { %v2131_v30 = vpop.permute.xlu1 %2130 }
 0x37d   :  { %v2139_v32 = vsel %vm144_vm0, %v2129_v25, %v2131_v30 }
 0x37e   :  { %4113 = vmatprep.subr.msk.bf16.mxu1 %vm155_vm1, %v2139_v32  ;;  %v2490_v51 = vpop.permute.xlu0 %2489 }
 0x37f   :  { %2205 = vmatpush1.bf16.msra.mxu1 %v2152_v33 }
 0x380   :  { %v2133_v34 = vpop.permute.xlu1 %2132 }
 0x381   :  { %v2140_v35 = vsel %vm144_vm0, %v2131_v30, %v2133_v34  ;;  %v2141_v36 = vsel %vm144_vm0, %v2133_v34, %v2135_v26  ;;  %v4130_v26 = vld [vmem:[%s5226_s2 + $0x6] sm:$0x3]  ;;  %vm5234_vm0 = vcmask 1043456  }
 0x382   :  { %v2158_v38 = vsel %vm155_vm1, %v2140_v35, 0  ;;  %4114 = vmatmul.mubr.msk.bf16.vlgmr.msra.gmra.mrb[4].mxu1 %vm151_vm2, %v4110_v24  ;;  %4115 = vmatprep.subr.msk.bf16.mxu1 %vm155_vm1, %v2141_v36  ;;  %v2494_v0 = vpop.permute.xlu0 %2493  ;;  %vm5244_vm10 = vmmov %vm5234_vm0 }
 0x383   :  { %2246 = vmatpush1.bf16.msra.mxu1 %v2158_v38  ;;  %2277 = vmatprep.mubr.bf16.mxu1 %v4430_v3  ;;  %v4137_v38 = vld [vmem:[%s5226_s2 + $0x8] sm:$0x3]  ;;  %vm5245_vm11 = vmmov %vm5234_vm0 }
 0x384   :  { %v2287_v39 = vpop.permute.xlu1 %2286 }
 0x385   :  { %v2300_v41 = vsel %vm311_vm3, %v2287_v39, %v2289_v37  ;;  %v4138_v39 = vld.sshfl [vmem:[#allocation2 + $0xa] sm:$0x33 pattern:$0x76325410] }
 0x386   :  { %v2310_v50 = vsel %vm155_vm1, %v2300_v41, 0  ;;  %v2498_v8 = vpop.permute.xlu0 %2497  ;;  %v2898_v41 = vcombine.high %v4138_v39, %v4138_v39 }
 0x388   :  { %v2291_v46 = vpop.permute.xlu1 %2290 }
 0x389   :  { %v2301_v48 = vsel %vm311_vm3, %v2289_v37, %v2291_v46  ;;  %v2302_v56 = vsel %vm311_vm3, %v2291_v46, %v2293_v44  ;;  %v2903_v37 = vsel %vm155_vm1, %v4901_v57, 0 }
 0x38a   :  { %4116 = vmatmul.mubr.msk.bf16.vlgmr.msra.gmra.mrb[8].mxu1 %vm151_vm2, %v4110_v24  ;;  %4117 = vmatprep.subr.msk.bf16.mxu1 %vm155_vm1, %v2301_v48  ;;  %v2316_v31 = vsel %vm155_vm1, %v2302_v56, 0  ;;  %v2502_v16 = vpop.permute.xlu0 %2501 }
 0x38b   :  { %2328 = vmatpush1.bf16.msra.mxu1 %v2310_v50  ;;  %2359 = vmatprep.mubr.bf16.mxu1 %v4430_v3 }
 0x38c   :  { %v2295_v52 = vpop.permute.xlu1 %2294 }
 0x38d   :  { %v2303_v54 = vsel %vm311_vm3, %v2293_v44, %v2295_v52  ;;  %v2304_v53 = vsel %vm311_vm3, %v2295_v52, %v2297_v55 }
 0x38e   :  { %4119 = vmatprep.subr.msk.bf16.mxu1 %vm155_vm1, %v2303_v54  ;;  %v2322_v2 = vsel %vm155_vm1, %v2304_v53, 0  ;;  %v2701_v45 = vpop.permute.xlu0 %2700 }
 0x390   :  { %v2299_v59 = vpop.permute.xlu1 %2298 }
 0x391   :  { %v2305_v61 = vsel %vm311_vm3, %v2297_v55, %v2299_v59  ;;  %v4145_v59 = vld [vmem:[%s5226_s2 + $0xa] sm:$0x3]  ;;  %vm5237_vm3 = vmmov %vm5234_vm0 }
 0x392   :  { %4118 = vmatmul.mubr.msk.bf16.vlgmr.msra.gmra.mrb[0].mxu1 %vm151_vm2, %v2084_v58  ;;  %v2705_v23 = vpop.permute.xlu0 %2704 }
 0x393   :  { %2369 = vmatpush1.bf16.msra.mxu1 %v2316_v31  ;;  %2400 = vmatprep.mubr.bf16.mxu1 %v4430_v3 }
 0x394   :  { %4121 = vmatprep.subr.msk.bf16.mxu1 %vm155_vm1, %v2305_v61  ;;  %v2492_v62 = vpop.permute.xlu1 %2491 }
 0x395   :  { %v2504_v6 = vsel %vm515_vm4, %v2492_v62, %v2494_v0  ;;  %v2503_v9 = vsel %vm515_vm4, %v2490_v51, %v2492_v62 }
 0x396   :  { %v2513_v10 = vsel %vm155_vm1, %v2503_v9, 0  ;;  %v2709_v32 = vpop.permute.xlu0 %2708 }
 0x398   :  { %v2496_v7 = vpop.permute.xlu1 %2495 }
 0x399   :  { %v2506_v11 = vsel %vm515_vm4, %v2496_v7, %v2498_v8  ;;  %v2505_v13 = vsel %vm515_vm4, %v2494_v0, %v2496_v7 }
 0x39a   :  { %4120 = vmatmul.mubr.msk.bf16.vlgmr.msra.gmra.mrb[4].mxu1 %vm151_vm2, %v2084_v58  ;;  %v2519_v17 = vsel %vm155_vm1, %v2505_v13, 0  ;;  %v3089_v57 = vpop.permute.xlu0 %3088 }
 0x39b   :  { %2410 = vmatpush1.bf16.msra.mxu1 %v2322_v2  ;;  %2441 = vmatprep.mubr.bf16.mxu1 %v4430_v3 }
 0x39c   :  { %4124 = vmatprep.subr.msk.bf16.mxu1 %vm155_vm1, %v2504_v6  ;;  %v2500_v12 = vpop.permute.xlu1 %2499 }
 0x39d   :  { %v2508_v42 = vsel %vm515_vm4, %v2500_v12, %v2502_v16  ;;  %v2507_v19 = vsel %vm515_vm4, %v2498_v8, %v2500_v12  ;;  %v4152_v16 = vld [vmem:[%s5226_s2 + $0xc] sm:$0x3]  ;;  %vm5238_vm4 = vmmov %vm5234_vm0 }
 0x39e   :  { %v2525_v20 = vsel %vm155_vm1, %v2507_v19, 0  ;;  %v3093_v46 = vpop.permute.xlu0 %3092 }
 0x3a0   :  { %v2699_v18 = vpop.permute.xlu1 %2698 }
 0x3a1   :  { %v2712_v43 = vsel %vm725_vm5, %v2699_v18, %v2701_v45 }
 0x3a2   :  { %4122 = vmatmul.mubr.msk.bf16.vlgmr.msra.gmra.mrb[8].mxu1 %vm151_vm2, %v2084_v58  ;;  %v2722_v24 = vsel %vm155_vm1, %v2712_v43, 0  ;;  %v3097_v52 = vpop.permute.xlu0 %3096 }
 0x3a3   :  { %2531 = vmatpush1.bf16.msra.mxu1 %v2513_v10  ;;  %2562 = vmatprep.mubr.bf16.mxu1 %v4430_v3 }
 0x3a4   :  { %4126 = vmatprep.subr.msk.bf16.mxu1 %vm155_vm1, %v2506_v11  ;;  %v2703_v40 = vpop.permute.xlu1 %2702 }
 0x3a5   :  { %v2713_v21 = vsel %vm725_vm5, %v2701_v45, %v2703_v40  ;;  %v2714_v15 = vsel %vm725_vm5, %v2703_v40, %v2705_v23 }
 0x3a6   :  { %v2728_v33 = vsel %vm155_vm1, %v2714_v15, 0  ;;  %v3101_v61 = vpop.permute.xlu0 %3100 }
 0x3a8   :  { %v2707_v22 = vpop.permute.xlu1 %2706 }
 0x3a9   :  { %v2715_v25 = vsel %vm725_vm5, %v2705_v23, %v2707_v22  ;;  %v2716_v35 = vsel %vm725_vm5, %v2707_v22, %v2709_v32 }
 0x3aa   :  { %4125 = vmatmul.mubr.msk.bf16.vlgmr.msra.gmra.mrb[0].mxu1 %vm151_vm2, %v4123_v14  ;;  %v2734_v36 = vsel %vm155_vm1, %v2716_v35, 0  ;;  %v3300_v2 = vpop.permute.xlu0 %3299 }
 0x3ab   :  { %2572 = vmatpush1.bf16.msra.mxu1 %v2519_v17  ;;  %2603 = vmatprep.mubr.bf16.mxu1 %v4430_v3 }
 0x3ac   :  { %4128 = vmatprep.subr.msk.bf16.mxu1 %vm155_vm1, %v2508_v42  ;;  %v2711_v30 = vpop.permute.xlu1 %2710 }
 0x3ad   :  { %v2717_v34 = vsel %vm725_vm5, %v2709_v32, %v2711_v30  ;;  %v4159_v32 = vld [vmem:[%s5226_s2 + $0xe] sm:$0x3]  ;;  %vm5239_vm5 = vmmov %vm5234_vm0 }
 0x3ae   :  { %v3304_v8 = vpop.permute.xlu0 %3303 }
 0x3b0   :  { %v3091_v44 = vpop.permute.xlu1 %3090 }
 0x3b1   :  { %v3103_v48 = vsel %vm1116_vm6, %v3091_v44, %v3093_v46  ;;  %v3102_v50 = vsel %vm1116_vm6, %v3089_v57, %v3091_v44 }
 0x3b2   :  { %4127 = vmatmul.mubr.msk.bf16.vlgmr.msra.gmra.mrb[4].mxu1 %vm151_vm2, %v4123_v14  ;;  %v3112_v54 = vsel %vm155_vm1, %v3102_v50, 0  ;;  %v3308_v13 = vpop.permute.xlu0 %3307  ;;  %v4166_v50 = vld [vmem:[%s5226_s2 + $0x10] sm:$0x3] }
 0x3b3   :  { %2613 = vmatpush1.bf16.msra.mxu1 %v2525_v20  ;;  %2644 = vmatprep.mubr.bf16.mxu1 %v4430_v3 }
 0x3b4   :  { %4131 = vmatprep.subr.msk.bf16.mxu1 %vm155_vm1, %v2713_v21 }
 0x3b6   :  { %v3507_v19 = vpop.permute.xlu0 %3506 }
 0x3ba   :  { %4129 = vmatmul.mubr.msk.bf16.vlgmr.msra.gmra.mrb[8].mxu1 %vm151_vm2, %v4123_v14  ;;  %v3511_v20 = vpop.permute.xlu0 %3510 }
 0x3bb   :  { %2740 = vmatpush1.bf16.msra.mxu1 %v2722_v24  ;;  %2771 = vmatprep.mubr.bf16.mxu1 %v4430_v3 }
 0x3bc   :  { %4133 = vmatprep.subr.msk.bf16.mxu1 %vm155_vm1, %v2715_v25 }
 0x3be   :  { %v3515_v24 = vpop.permute.xlu0 %3514 }
 0x3c2   :  { %4132 = vmatmul.mubr.msk.bf16.vlgmr.msra.gmra.mrb[0].mxu1 %vm151_vm2, %v4130_v26 }
 0x3c3   :  { %2781 = vmatpush1.bf16.msra.mxu1 %v2728_v33  ;;  %2812 = vmatprep.mubr.bf16.mxu1 %v4430_v3  ;;  %v3519_v33 = vpop.permute.xlu0 %3518 }
 0x3c4   :  { %4135 = vmatprep.subr.msk.bf16.mxu1 %vm155_vm1, %v2717_v34 }
 0x3ca   :  { %4134 = vmatmul.mubr.msk.bf16.vlgmr.msra.gmra.mrb[4].mxu1 %vm151_vm2, %v4130_v26 }
 0x3cb   :  { %2822 = vmatpush1.bf16.msra.mxu1 %v2734_v36  ;;  %2853 = vmatprep.mubr.bf16.mxu1 %v4430_v3 }
 0x3cc   :  { %4139 = vmatprep.subr.msk.bf16.mxu1 %vm155_vm1, %v4920_v63  ;;  %v2909_v63 = vsel %vm155_vm1, %v4907_v60, 0  ;;  %v3095_v60 = vpop.permute.xlu1 %3094 }
 0x3cd   :  { %v3105_v55 = vsel %vm1116_vm6, %v3095_v60, %v3097_v52  ;;  %v3104_v58 = vsel %vm1116_vm6, %v3093_v46, %v3095_v60 }
 0x3ce   :  { %v3118_v31 = vsel %vm155_vm1, %v3104_v58, 0 }
 0x3d0   :  { %v3099_v56 = vpop.permute.xlu1 %3098 }
 0x3d1   :  { %v3107_v53 = vsel %vm1116_vm6, %v3099_v56, %v3101_v61  ;;  %v3106_v62 = vsel %vm1116_vm6, %v3097_v52, %v3099_v56  ;;  %vm5240_vm6 = vmmov %vm5234_vm0 }
 0x3d2   :  { %4136 = vmatmul.mubr.msk.bf16.vlgmr.msra.gmra.mrb[8].mxu1 %vm151_vm2, %v4130_v26  ;;  %v3124_v6 = vsel %vm155_vm1, %v3106_v62, 0 }
 0x3d3   :  { %2921 = vmatpush1.bf16.msra.mxu1 %v2903_v37  ;;  %2952 = vmatprep.mubr.bf16.mxu1 %v4430_v3 }
 0x3d4   :  { %4141 = vmatprep.subr.msk.bf16.mxu1 %vm155_vm1, %v4928_v4  ;;  %v2915_v4 = vsel %vm155_vm1, %v4138_v39, 0  ;;  %v3298_v51 = vpop.permute.xlu1 %3297  ;;  %v3718_v39 = vpop.permute.xlu0 %3717 }
 0x3d5   :  { %v3311_v9 = vsel %vm1326_vm7, %v3298_v51, %v3300_v2 }
 0x3d6   :  { %v3321_v11 = vsel %vm155_vm1, %v3311_v9, 0 }
 0x3d8   :  { %v3302_v0 = vpop.permute.xlu1 %3301  ;;  %v3722_v46 = vpop.permute.xlu0 %3721 }
 0x3d9   :  { %v3312_v7 = vsel %vm1326_vm7, %v3300_v2, %v3302_v0  ;;  %v3313_v14 = vsel %vm1326_vm7, %v3302_v0, %v3304_v8 }
 0x3da   :  { %4140 = vmatmul.mubr.msk.bf16.vlgmr.msra.gmra.mrb[0].mxu1 %vm151_vm2, %v4137_v38  ;;  %v3327_v18 = vsel %vm155_vm1, %v3313_v14, 0 }
 0x3db   :  { %2962 = vmatpush1.bf16.msra.mxu1 %v2909_v63  ;;  %2993 = vmatprep.mubr.bf16.mxu1 %v4430_v3 }
 0x3dc   :  { %4143 = vmatprep.subr.msk.bf16.mxu1 %vm155_vm1, %v2898_v41  ;;  %v3306_v10 = vpop.permute.xlu1 %3305 }
 0x3dd   :  { %v3314_v12 = vsel %vm1326_vm7, %v3304_v8, %v3306_v10  ;;  %v3315_v40 = vsel %vm1326_vm7, %v3306_v10, %v3308_v13 }
 0x3de   :  { %v3333_v21 = vsel %vm155_vm1, %v3315_v40, 0 }
 0x3e0   :  { %v3310_v17 = vpop.permute.xlu1 %3309 }
 0x3e1   :  { %v3316_v42 = vsel %vm1326_vm7, %v3308_v13, %v3310_v17  ;;  %vm5241_vm7 = vmmov %vm5234_vm0 }
 0x3e2   :  { %4142 = vmatmul.mubr.msk.bf16.vlgmr.msra.gmra.mrb[4].mxu1 %vm151_vm2, %v4137_v38 }
 0x3e3   :  { %3003 = vmatpush1.bf16.msra.mxu1 %v2915_v4  ;;  %3034 = vmatprep.mubr.bf16.mxu1 %v4430_v3 }
 0x3e4   :  { %4146 = vmatprep.subr.msk.bf16.mxu1 %vm155_vm1, %v3103_v48  ;;  %v3509_v45 = vpop.permute.xlu1 %3508 }
 0x3e5   :  { %v3521_v43 = vsel %vm1536_vm8, %v3509_v45, %v3511_v20  ;;  %v3520_v23 = vsel %vm1536_vm8, %v3507_v19, %v3509_v45 }
 0x3e6   :  { %v3530_v25 = vsel %vm155_vm1, %v3520_v23, 0 }
 0x3e8   :  { %v3513_v22 = vpop.permute.xlu1 %3512 }
 0x3e9   :  { %v3523_v15 = vsel %vm1536_vm8, %v3513_v22, %v3515_v24  ;;  %v3522_v30 = vsel %vm1536_vm8, %v3511_v20, %v3513_v22 }
 0x3ea   :  { %4144 = vmatmul.mubr.msk.bf16.vlgmr.msra.gmra.mrb[8].mxu1 %vm151_vm2, %v4137_v38  ;;  %v3536_v34 = vsel %vm155_vm1, %v3522_v30, 0 }
 0x3eb   :  { %3130 = vmatpush1.bf16.msra.mxu1 %v3112_v54  ;;  %3161 = vmatprep.mubr.bf16.mxu1 %v4430_v3  ;;  %v3726_v54 = vpop.permute.xlu0 %3725 }
 0x3ec   :  { %4148 = vmatprep.subr.msk.bf16.mxu1 %vm155_vm1, %v3105_v55  ;;  %v3517_v26 = vpop.permute.xlu1 %3516 }
 0x3ed   :  { %v3525_v36 = vsel %vm1536_vm8, %v3517_v26, %v3519_v33  ;;  %v3524_v37 = vsel %vm1536_vm8, %v3515_v24, %v3517_v26  ;;  %vm5242_vm8 = vmmov %vm5234_vm0 }
 0x3ee   :  { %v3542_v63 = vsel %vm155_vm1, %v3524_v37, 0 }
 0x3f0   :  { %v3716_v35 = vpop.permute.xlu1 %3715 }
 0x3f1   :  { %v3729_v57 = vsel %vm1746_vm9, %v3716_v35, %v3718_v39 }
 0x3f2   :  { %4147 = vmatmul.mubr.msk.bf16.vlgmr.msra.gmra.mrb[0].mxu1 %vm151_vm2, %v4145_v59  ;;  %v3739_v4 = vsel %vm155_vm1, %v3729_v57, 0 }
 0x3f3   :  { %3171 = vmatpush1.bf16.msra.mxu1 %v3118_v31  ;;  %3202 = vmatprep.mubr.bf16.mxu1 %v4430_v3 }
 0x3f4   :  { %4150 = vmatprep.subr.msk.bf16.mxu1 %vm155_vm1, %v3107_v53  ;;  %v3720_v38 = vpop.permute.xlu1 %3719 }
 0x3f5   :  { %v3730_v41 = vsel %vm1746_vm9, %v3718_v39, %v3720_v38  ;;  %v3731_v60 = vsel %vm1746_vm9, %v3720_v38, %v3722_v46  ;;  %v3928_v39 = vld [vmem:[%s5227_s3] sm:$0xf] }
 0x3f6   :  { %v3745_v55 = vsel %vm155_vm1, %v3731_v60, 0 }
 0x3f8   :  { %v3724_v44 = vpop.permute.xlu1 %3723 }
 0x3f9   :  { %v3732_v48 = vsel %vm1746_vm9, %v3722_v46, %v3724_v44  ;;  %v3733_v58 = vsel %vm1746_vm9, %v3724_v44, %v3726_v54 }
 0x3fa   :  { %4149 = vmatmul.mubr.msk.bf16.vlgmr.msra.gmra.mrb[4].mxu1 %vm151_vm2, %v4145_v59 }
 0x3fb   :  { %3212 = vmatpush1.bf16.msra.mxu1 %v3124_v6  ;;  %3243 = vmatprep.mubr.bf16.mxu1 %v4430_v3 }
 0x3fc   :  { %4153 = vmatprep.subr.msk.bf16.mxu1 %vm155_vm1, %v3312_v7  ;;  %v3728_v52 = vpop.permute.xlu1 %3727 }
 0x3fd   :  { %v3734_v56 = vsel %vm1746_vm9, %v3726_v54, %v3728_v52  ;;  %vm5243_vm9 = vmmov %vm5234_vm0 }
 0x402   :  { %4151 = vmatmul.mubr.msk.bf16.vlgmr.msra.gmra.mrb[8].mxu1 %vm151_vm2, %v4145_v59  ;;  %v3751_v59 = vsel %vm155_vm1, %v3733_v58, 0 }
 0x403   :  { %3339 = vmatpush1.bf16.msra.mxu1 %v3321_v11  ;;  %3370 = vmatprep.mubr.bf16.mxu1 %v4430_v3 }
 0x404   :  { %4155 = vmatprep.subr.msk.bf16.mxu1 %vm155_vm1, %v3314_v12 }
 0x40a   :  { %4154 = vmatmul.mubr.msk.bf16.vlgmr.msra.gmra.mrb[0].mxu1 %vm151_vm2, %v4152_v16 }
 0x40b   :  { %3380 = vmatpush1.bf16.msra.mxu1 %v3327_v18  ;;  %3411 = vmatprep.mubr.bf16.mxu1 %v4430_v3 }
 0x40c   :  { %4157 = vmatprep.subr.msk.bf16.mxu1 %vm155_vm1, %v3316_v42 }
 0x412   :  { %4156 = vmatmul.mubr.msk.bf16.vlgmr.msra.gmra.mrb[4].mxu1 %vm151_vm2, %v4152_v16 }
 0x413   :  { %3421 = vmatpush1.bf16.msra.mxu1 %v3333_v21  ;;  %3452 = vmatprep.mubr.bf16.mxu1 %v4430_v3 }
 0x414   :  { %4160 = vmatprep.subr.msk.bf16.mxu1 %vm155_vm1, %v3521_v43 }
 0x41a   :  { %4158 = vmatmul.mubr.msk.bf16.vlgmr.msra.gmra.mrb[8].mxu1 %vm151_vm2, %v4152_v16 }
 0x41b   :  { %3548 = vmatpush1.bf16.msra.mxu1 %v3530_v25  ;;  %3579 = vmatprep.mubr.bf16.mxu1 %v4430_v3 }
 0x41c   :  { %4162 = vmatprep.subr.msk.bf16.mxu1 %vm155_vm1, %v3523_v15 }
 0x422   :  { %4161 = vmatmul.mubr.msk.bf16.vlgmr.msra.gmra.mrb[0].mxu1 %vm151_vm2, %v4159_v32 }
 0x423   :  { %3589 = vmatpush1.bf16.msra.mxu1 %v3536_v34  ;;  %3620 = vmatprep.mubr.bf16.mxu1 %v4430_v3 }
 0x424   :  { %4164 = vmatprep.subr.msk.bf16.mxu1 %vm155_vm1, %v3525_v36 }
 0x42a   :  { %4163 = vmatmul.mubr.msk.bf16.vlgmr.msra.gmra.mrb[4].mxu1 %vm151_vm2, %v4159_v32 }
 0x42b   :  { %3630 = vmatpush1.bf16.msra.mxu1 %v3542_v63  ;;  %3661 = vmatprep.mubr.bf16.mxu1 %v4430_v3 }
 0x42c   :  { %4167 = vmatprep.subr.msk.bf16.mxu1 %vm155_vm1, %v3730_v41 }
 0x432   :  { %4165 = vmatmul.mubr.msk.bf16.vlgmr.msra.gmra.mrb[8].mxu1 %vm151_vm2, %v4159_v32 }
 0x433   :  { %3757 = vmatpush1.bf16.msra.mxu1 %v3739_v4  ;;  %3788 = vmatprep.mubr.bf16.mxu1 %v4430_v3 }
 0x434   :  { %4169 = vmatprep.subr.msk.bf16.mxu1 %vm155_vm1, %v3732_v48 }
 0x43a   :  { %4168 = vmatmul.mubr.msk.bf16.vlgmr.msra.gmra.mrb[0].mxu1 %vm151_vm2, %v4166_v50 }
 0x43b   :  { %3798 = vmatpush1.bf16.msra.mxu1 %v3745_v55  ;;  %3829 = vmatprep.mubr.bf16.mxu1 %v4430_v3 }
 0x43c   :  { %4171 = vmatprep.subr.msk.bf16.mxu1 %vm155_vm1, %v3734_v56  ;;  %vm5235_vm1 = vmmov %vm5234_vm0 }
 0x442   :  { %4170 = vmatmul.mubr.msk.bf16.vlgmr.msra.gmra.mrb[4].mxu1 %vm151_vm2, %v4166_v50 }
 0x443   :  { %3839 = vmatpush1.bf16.msra.mxu1 %v3751_v59  ;;  %3870 = vmatprep.mubr.bf16.mxu1 %v4430_v3 }
 0x44a   :  { %4172 = vmatmul.mubr.msk.bf16.vlgmr.msra.gmra.mrb[8].mxu1 %vm151_vm2, %v4166_v50  ;;  %vm5236_vm2 = vmmov %vm5234_vm0 }
 0x50d   :  { %v5158_v61 = vpop.f32.mrb[0].mxu1 }
 0x50e   :  { %v3885_v31 = vmul.f32 %v5158_v61, %v4801_v27  ;;  %v5162_v51 = vpop.f32.mrb[1].mxu1 }
 0x50f   :  { %v3886_v53 = vmul.f32 %v5162_v51, %v4803_v28  ;;  %v3794_v62 = vpop.f32.mrb[2].mxu1 }
 0x510   :  { %v3891_v0 = vsel %vm5234_vm0, %v3885_v31, 0.0  ;;  %v3904_v2 = vmul.f32 %v3885_v31, %v5158_v61  ;;  %v3795_v6 = vpop.f32.mrb[3].mxu1 }
 0x511   :  { %v3892_v3 = vsel %vm5235_vm1, %v3886_v53, 0.0  ;;  %v3905_v7 = vmul.f32 %v3886_v53, %v5162_v51 }
 0x512   :  { %v3910_v9 = vsel %vm5236_vm2, %v3904_v2, 0.0  ;;  %v3893_v8 = vadd.f32 %v3892_v3, %v3891_v0 }
 0x513   :  { %v3911_v27 = vsel %vm5237_vm3, %v3905_v7, 0.0 }
 0x514   :  { %v3912_v10 = vadd.f32 %v3911_v27, %v3910_v9 }
 0x515   :  { %v3831_v11 = vpop.f32.mrb[4].mxu1 }
 0x516   :  { %v3887_v12 = vmul.f32 %v3831_v11, %v4820_v47  ;;  %v3833_v28 = vpop.f32.mrb[5].mxu1 }
 0x517   :  { %v3888_v13 = vmul.f32 %v3833_v28, %v4823_v49  ;;  %v3835_v14 = vpop.f32.mrb[6].mxu1 }
 0x518   :  { %v3894_v16 = vsel %vm5238_vm4, %v3887_v12, 0.0  ;;  %v3906_v17 = vmul.f32 %v3887_v12, %v3831_v11  ;;  %v3836_v18 = vpop.f32.mrb[7].mxu1 }
 0x519   :  { %v3895_v42 = vadd.f32 %v3894_v16, %v3893_v8  ;;  %v3896_v19 = vsel %vm5239_vm5, %v3888_v13, 0.0  ;;  %v3907_v40 = vmul.f32 %v3888_v13, %v3833_v28  ;;  %v3985_v18 = vstv %s5231_s7 }
 0x51a   :  { %v3913_v45 = vsel %vm5240_vm6, %v3906_v17, 0.0 }
 0x51b   :  { %v3914_v20 = vadd.f32 %v3913_v45, %v3912_v10  ;;  %v3897_v21 = vadd.f32 %v3896_v19, %v3895_v42  ;;  %v3915_v43 = vsel %vm5241_vm7, %v3907_v40, 0.0  ;;  %v3993_v19 = vld [vmem:[%s5224_s0 + $0x8] sm:$0xff]  ;;  %v3994_v40 = vld [vmem:[%s5224_s0 + $0x10] sm:$0xff] }
 0x51d   :  { %v3916_v22 = vadd.f32 %v3915_v43, %v3914_v20  ;;  %v3872_v47 = vpop.f32.mrb[8].mxu1 }
 0x51e   :  { %v3889_v23 = vmul.f32 %v3872_v47, %v4832_v1  ;;  %v3874_v49 = vpop.f32.mrb[9].mxu1 }
 0x51f   :  { %v3890_v24 = vmul.f32 %v3874_v49, %v4835_v5  ;;  %v3876_v25 = vpop.f32.mrb[10].mxu1  ;;  %v3954_v5 = vld [vmem:[%s5228_s4] sm:$0xf] }
 0x520   :  { %v3898_v15 = vsel %vm5242_vm8, %v3889_v23, 0.0  ;;  %v3908_v26 = vmul.f32 %v3889_v23, %v3872_v47  ;;  %v3877_v30 = vpop.f32.mrb[11].mxu1  ;;  %v4000_v25 = vcombine.high %v3994_v40, %v3994_v40 }
 0x521   :  { %v3909_v32 = vmul.f32 %v3890_v24, %v3874_v49  ;;  %v3899_v33 = vadd.f32 %v3898_v15, %v3897_v21  ;;  %v3900_v34 = vsel %vm5243_vm9, %v3890_v24, 0.0  ;;  %v3999_v24 = vcombine.high %v3993_v19, %v3993_v19 }
 0x522   :  { %v3917_v35 = vsel %vm5244_vm10, %v3908_v26, 0.0 }
 0x523   :  { %v3901_v36 = vadd.f32 %v3900_v34, %v3899_v33  ;;  %v3918_v37 = vadd.f32 %v3917_v35, %v3916_v22  ;;  %v3919_v38 = vsel %vm5245_vm11, %v3909_v32, 0.0 }
 0x525   :  { %3902 = vadd.xlane.f32.xlu0 %v3901_v36  ;;  %v3920_v1 = vadd.f32 %v3919_v38, %v3918_v37 }
 0x527   :  { %3921 = vadd.xlane.f32.xlu1 %v3920_v1 }
 0x538   :  { %3957 = vperm.xlu1 %4377, %v3954_v5  }
 0x53b   :  { %3937 = vperm.xlu0 %4376, %v3928_v39  }
 0x5b2   :  { %v3903_v63 = vpop.xlane.xlu0 %3902 }
 0x5b3   :  { %v3923_v41 = vmul.f32 0.001953125, %v3903_v63 }
 0x5b4   :  { %v3922_v57 = vpop.xlane.xlu1 %3921 }
 0x5b5   :  { %v3924_v44 = vmul.f32 0.001953125, %v3922_v57  ;;  %v3925_v46 = vmul.f32 %v3923_v41, %v3923_v41  ;;  %v3929_v52 = vsub.f32 %v5158_v61, %v3923_v41  ;;  %v3930_v54 = vsub.f32 %v5162_v51, %v3923_v41  ;;  %v3992_v61 = vld [vmem:[%s5224_s0] sm:$0xff]  ;;  %s4440_s0 = smov [#allocation5]  }
 0x5b6   :  { %v3931_v55 = vsub.f32 %v3831_v11, %v3923_v41  ;;  %v3932_v56 = vsub.f32 %v3833_v28, %v3923_v41  ;;  %v3933_v58 = vsub.f32 %v3872_v47, %v3923_v41  ;;  %v3934_v59 = vsub.f32 %v3874_v49, %v3923_v41  ;;  %s4031_s7 = sshll.u32 %s4440_s0, 4  ;;  %s4032_s7 = int_to_ptr.vmem [resolvable:$true] %s4031_s7 }
 0x5b7   :  { %v3926_v4 = vsub.f32 %v3924_v44, %v3925_v46  ;;  %v3998_v42 = vcombine.high %v3992_v61, %v3992_v61  ;;  %s4406_s12 = scalar_lea.vmem %s4032_s7, 384  ;;  %p4411_p1 = scmp.lt.s32.totalorder %s4032_s7, %s4032_s7 }
 0x5b8   :  { %v3958_v51 = vpop.permute.xlu1 %3957  ;;  %p4407_p0 = scmp.ne.s32.totalorder %s4032_s7, %s4406_s12  ;;  %p4412_p2 = scmp.lt.s32.totalorder %s4406_s12, %s4406_s12 }
 0x5b9   :  { %v3927_v48 = vmax.f32 %v3926_v4, 0.0 }
 0x5ba   :  { %v3938_v50 = vpop.permute.xlu0 %3937  ;;  %p4413_p3 = por %p4412_p2, %p4411_p1 }
 0x5bb   :  { %v3946_v60 = vadd.f32 1e-05, %v3927_v48  ;;  %v3940_v31 = vmul.f32 %v3938_v50, %v3929_v52  ;;  %v3941_v53 = vmul.f32 %v3938_v50, %v3930_v54  ;;  %v3942_v62 = vmul.f32 %v3938_v50, %v3931_v55 }
 0x5bc   :  { %v3943_v0 = vmul.f32 %v3938_v50, %v3932_v56  ;;  %v3944_v6 = vmul.f32 %v3938_v50, %v3933_v58  ;;  %v3945_v3 = vmul.f32 %v3938_v50, %v3934_v59  ;;  %p4414_p4 = pnand %p4413_p3, %p4407_p0 }
 0x5bd   :  { %4402 = vrsqrt.f32 %v3946_v60 }
 0x5c7   :  { %v4403_v2 = vpop.eup %4402 }
 0x5c8   :  { %v3948_v7 = vmul.f32 %v4403_v2, %v3940_v31  ;;  %v3949_v9 = vmul.f32 %v4403_v2, %v3941_v53  ;;  %v3950_v8 = vmul.f32 %v4403_v2, %v3942_v62  ;;  %v3951_v27 = vmul.f32 %v4403_v2, %v3943_v0 }
 0x5c9   :  { %v3952_v10 = vmul.f32 %v4403_v2, %v3944_v6  ;;  %v3953_v11 = vmul.f32 %v4403_v2, %v3945_v3 }
 0x5ca   :  { %v3960_v12 = vadd.f32 %v3958_v51, %v3948_v7  ;;  %v3961_v28 = vadd.f32 %v3958_v51, %v3949_v9  ;;  %v3962_v13 = vadd.f32 %v3958_v51, %v3950_v8  ;;  %v3963_v14 = vadd.f32 %v3958_v51, %v3951_v27 }
 0x5cb   :  { %v3964_v16 = vadd.f32 %v3958_v51, %v3952_v10  ;;  %v3965_v17 = vadd.f32 %v3958_v51, %v3953_v11 }
 0x5cc   :  { %vm3966_vm12 = vcmp.gt.f32.partialorder %v3960_v12, 0.0  ;;  %vm3967_vm13 = vcmp.gt.f32.partialorder %v3961_v28, 0.0  ;;  %vm3968_vm14 = vcmp.gt.f32.partialorder %v3962_v13, 0.0  ;;  %vm3969_vm15 = vcmp.gt.f32.partialorder %v3963_v14, 0.0 }
 0x5cd   :  { %vm3970_vm0 = vcmp.gt.f32.partialorder %v3964_v16, 0.0  ;;  %vm3971_vm1 = vcmp.gt.f32.partialorder %v3965_v17, 0.0  ;;  %v3972_v45 = vmul.f32 %v3960_v12, %v4854_v29  ;;  %v3973_v20 = vmul.f32 %v3961_v28, %v4854_v29 }
 0x5ce   :  { %v3974_v21 = vmul.f32 %v3962_v13, %v4854_v29  ;;  %v3975_v43 = vmul.f32 %v3963_v14, %v4854_v29  ;;  %v3976_v22 = vmul.f32 %v3964_v16, %v4854_v29  ;;  %v3977_v47 = vmul.f32 %v3965_v17, %v4854_v29 }
 0x5cf   :  { %v3978_v23 = vsel %vm3966_vm12, %v3960_v12, %v3972_v45  ;;  %v3979_v49 = vsel %vm3967_vm13, %v3961_v28, %v3973_v20 }
 0x5d0   :  { %v3980_v15 = vsel %vm3968_vm14, %v3962_v13, %v3974_v21  ;;  %v3981_v26 = vsel %vm3969_vm15, %v3963_v14, %v3975_v43  ;;  %v3982_v30 = vsel %vm3970_vm0, %v3964_v16, %v3976_v22  ;;  %v3983_v32 = vsel %vm3971_vm1, %v3965_v17, %v3977_v47 }
 0x5d1   :  { %v3986_v33 = vmul.f32 %v3985_v18, %v3978_v23  ;;  %v3987_v34 = vmul.f32 %v3985_v18, %v3979_v49  ;;  %v3988_v35 = vmul.f32 %v3985_v18, %v3980_v15  ;;  %v3989_v36 = vmul.f32 %v3985_v18, %v3981_v26 }
 0x5d2   :  { %v3990_v37 = vmul.f32 %v3985_v18, %v3982_v30  ;;  %v3991_v38 = vmul.f32 %v3985_v18, %v3983_v32 }
 0x5d3   :  { %v4004_v1 = vadd.f32 %v3992_v61, %v3986_v33  ;;  %v4005_v5 = vadd.f32 %v3998_v42, %v3987_v34  ;;  %v4006_v39 = vadd.f32 %v3993_v19, %v3988_v35  ;;  %v4007_v29 = vadd.f32 %v3999_v24, %v3989_v36 }
 0x5d4   :  { %v4008_v63 = vadd.f32 %v3994_v40, %v3990_v37  ;;  %v4009_v41 = vadd.f32 %v4000_v25, %v3991_v38 }
 0x5d5   :  { %v4016_v57 = vcombine.low %v4004_v1, %v4005_v5  ;;  %v4017_v44 = vcombine.low %v4006_v39, %v4007_v29 }
 0x5d6   :  { %v4018_v46 = vcombine.low %v4008_v63, %v4009_v41 }
 0x5d7   :  { %4022 = vst [vmem:[#allocation5] sm:$0xff] %v4016_v57  ;;  %4023 = vst [vmem:[#allocation5 + $0x8] sm:$0xff] %v4017_v44 }
 0x5d8   :  { %4024 = vst [vmem:[#allocation5 + $0x10] sm:$0xff] %v4018_v46 }
 0x5d9   :  { %4417 = shalt.err (!%p4414_p4)
}
 0x5da   :  { %s4418_s15 = scalar_lea.hbm %s5232_s8, 384 }
 0x5db   :  { %p4419_p5 = scmp.ne.s32.totalorder %s5232_s8, %s4418_s15  ;;  %p4422_p6 = scmp.lt.u32.totalorder %s4418_s15, %s5232_s8 }
 0x5dd   :  { %p4424_p7 = pnand %p4422_p6, %p4419_p5 }
 0x5df   :  { %4427 = shalt.err (!%p4424_p7)
}
 0x5e0   :  { %4034 = dma.vmem_to_hbm [thread:$0]  %s4032_s7, 384, %s5232_s8, [#allocation6]  }
 0x5e1   :  { %4428 = dma.done.wait [#allocation6], 384  }
 0x5e2   :  { %4429 = vsyncadd [#allocation6], 4294966912 }
 0x5e3   :  { %4038 = vsyncpa [#allocation6], 1 }

</bundles_post_ra>
